<compile_context>
chip_gen: v6e
topology: v6e:2x2x1
jax: 0.10.0
libtpu: 0.0.40
codegen_flags: <defaults>
</compile_context>

<pallas_src>
import jax
import jax.numpy as jnp
from jax.experimental import pallas as pl
from jax.experimental.pallas import tpu as pltpu

_EPS = 1e-5       # PyTorch BatchNorm2d default
_LANE = 128       # TPU lane width


def _round_up(v, m):
    return -(-v // m) * m


# --------------------------------------------------------------------------- #
# Kernels
# --------------------------------------------------------------------------- #
def _make_conv1_kernel(nb, Ho, Wo, Cinp, Cp, stride, has_proj):
    """conv1 (3x3, any stride) as 9 tap-accumulated matmuls over phase windows.

    When has_proj, tap 4 (the centre tap, whose window is exactly the strided
    1x1-shortcut input) uses a weight widened to 2*Cp so one matmul yields both
    the conv1 contribution and the shortcut output.
    Also emits per-tile per-channel (sum, sum-of-squares) for batch-stats BN.
    """
    rows = nb * Ho * Wo
    n_phase = stride * stride

    def kernel(*refs):
        phase_refs = refs[:n_phase]
        idx = n_phase
        w1_ref = refs[idx]; idx += 1
        if has_proj:
            w4_ref = refs[idx]; idx += 1
            y1_ref, st1_ref, ysc_ref, stsc_ref = refs[idx:idx + 4]
        else:
            y1_ref, st1_ref = refs[idx:idx + 2]

        acc = None
        ysc = None
        for t in range(9):
            kh, kw = divmod(t, 3)
            p = (kh % stride) * stride + (kw % stride)
            oh, ow = kh // stride, kw // stride
            win = phase_refs[p][:, oh:oh + Ho, ow:ow + Wo, :].reshape(rows, Cinp)
            if has_proj and t == 4:
                r = jnp.dot(win, w4_ref[...], preferred_element_type=jnp.float32)
                d = r[:, :Cp]
                ysc = r[:, Cp:]
            else:
                d = jnp.dot(win, w1_ref[t], preferred_element_type=jnp.float32)
            acc = d if acc is None else acc + d

        y1_ref[...] = acc.reshape(nb, Ho, Wo, Cp).astype(y1_ref.dtype)
        s0 = jnp.sum(acc, axis=0, keepdims=True)
        s1 = jnp.sum(acc * acc, axis=0, keepdims=True)
        st1_ref[...] = jnp.concatenate([s0, s1], axis=0).reshape(1, 2, Cp)

        if has_proj:
            ysc_ref[...] = ysc.reshape(nb, Ho, Wo, Cp).astype(ysc_ref.dtype)
            t0 = jnp.sum(ysc, axis=0, keepdims=True)
            t1 = jnp.sum(ysc * ysc, axis=0, keepdims=True)
            stsc_ref[...] = jnp.concatenate([t0, t1], axis=0).reshape(1, 2, Cp)

    return kernel


def _make_conv2_kernel(nb, Ho, Wo, Cp, mm_dtype):
    """bn1 (folded scale/bias) + relu, then conv2 (3x3, stride 1) as 9
    tap-accumulated matmuls over a 1-halo padded VMEM scratch (mm dtype)."""
    rows = nb * Ho * Wo

    def kernel(y1_ref, s1_ref, b1_ref, w2_ref, y2_ref, st2_ref, h1pad_ref):
        # bn1 folded into per-channel scale/bias + relu (f32), cast once to mm
        h1 = jnp.maximum(
            y1_ref[...].reshape(rows, Cp).astype(jnp.float32)
            * s1_ref[...] + b1_ref[...], 0.0).astype(mm_dtype)

        # zero only the 1-wide halo, then write the interior once
        zr = jnp.zeros((nb, 1, Wo + 2, Cp), mm_dtype)
        zc = jnp.zeros((nb, Ho + 2, 1, Cp), mm_dtype)
        h1pad_ref[:, 0:1, :, :] = zr
        h1pad_ref[:, Ho + 1:Ho + 2, :, :] = zr
        h1pad_ref[:, :, 0:1, :] = zc
        h1pad_ref[:, :, Wo + 1:Wo + 2, :] = zc
        h1pad_ref[:, 1:Ho + 1, 1:Wo + 1, :] = h1.reshape(nb, Ho, Wo, Cp)

        acc = None
        for t in range(9):
            kh, kw = divmod(t, 3)
            win = h1pad_ref[:, kh:kh + Ho, kw:kw + Wo, :].reshape(rows, Cp)
            d = jnp.dot(win, w2_ref[t], preferred_element_type=jnp.float32)
            acc = d if acc is None else acc + d

        y2_ref[...] = acc.reshape(nb, Ho, Wo, Cp).astype(y2_ref.dtype)
        s0 = jnp.sum(acc, axis=0, keepdims=True)
        s1 = jnp.sum(acc * acc, axis=0, keepdims=True)
        st2_ref[...] = jnp.concatenate([s0, s1], axis=0).reshape(1, 2, Cp)

    return kernel


def _make_epilogue_kernel(nb, Ho, Wo, Cp, has_proj):
    """bn2 (folded scale/bias) + shortcut add + relu (f32 math, f32 output)."""
    rows = nb * Ho * Wo

    def kernel(*refs):
        if has_proj:
            y2_ref, ysc_ref, s2_ref, b2_ref, ssc_ref, bsc_ref, o_ref = refs
            sc = (ysc_ref[...].reshape(rows, Cp).astype(jnp.float32)
                  * ssc_ref[...] + bsc_ref[...])
        else:
            y2_ref, x_ref, s2_ref, b2_ref, o_ref = refs
            sc = x_ref[...].reshape(rows, Cp).astype(jnp.float32)
        out = jnp.maximum(
            y2_ref[...].reshape(rows, Cp).astype(jnp.float32)
            * s2_ref[...] + b2_ref[...] + sc, 0.0)
        o_ref[...] = out.reshape(nb, Ho, Wo, Cp)

    return kernel


# --------------------------------------------------------------------------- #
# Wrapper
# --------------------------------------------------------------------------- #
def basic_block_pallas(x_nchw, params, stride, *,
                       matmul_dtype=jnp.bfloat16, batch_block=None,
                       target_rows=512):
    """BasicBlock forward. x_nchw: (N, Cin, H, W) f32 -> (N, Cout, Ho, Wo) f32."""
    x = jnp.transpose(x_nchw, (0, 2, 3, 1)).astype(jnp.float32)   # NHWC
    N, H, W, Cin = x.shape
    Cout = params["w1"].shape[-1]
    Ho = (H + 2 - 3) // stride + 1
    Wo = (W + 2 - 3) // stride + 1
    Cinp = _round_up(Cin, _LANE)
    Cp = _round_up(Cout, _LANE)
    has_proj = "wsc" in params
    mm = matmul_dtype
    mm_bytes = jnp.dtype(mm).itemsize

    # phase decomposition of the padded input: tap (kh,kw) at stride s reads a
    # contiguous window of phase (kh%s, kw%s) at offset (kh//s, kw//s).
    ext = 2 // stride
    Hp, Wp = Ho + ext, Wo + ext
    n_phase = stride * stride

    # ---- pick batch tile (M tile): target rows >= target_rows, VMEM-budgeted
    def _vmem_est(nb_):
        rows_ = nb_ * Ho * Wo
        ka = (n_phase * nb_ * Hp * Wp * Cinp * mm_bytes * 2
              + 9 * Cinp * Cp * mm_bytes * 2
              + (Cinp * 2 * Cp * mm_bytes * 2 if has_proj else 0)
              + (2 if has_proj else 1) * (rows_ * Cp * mm_bytes * 2 + rows_ * Cp * 4))
        kb = (rows_ * Cp * mm_bytes * 2 * 2
              + 9 * Cp * Cp * mm_bytes * 2
              + nb_ * (Ho + 2) * (Wo + 2) * Cp * mm_bytes
              + rows_ * Cp * 4)
        return max(ka, kb)

    if batch_block is None:
        nb = max(1, min(N, -(-target_rows // (Ho * Wo))))
        budget = 40 * 1024 * 1024          # conservative: fits v7x's 64 MiB VMEM
        while nb > 1 and (N % nb != 0 or _vmem_est(nb) > budget):
            nb -= 1
    else:
        nb = batch_block
    assert N % nb == 0, "batch tile must divide N"
    G = N // nb
    rows = nb * Ho * Wo
    nhw = float(N * Ho * Wo)

    try:
        vmem_cap = pltpu.get_tpu_info().vmem_capacity_bytes
        vmem_limit = int(min(vmem_cap * 3 // 4, 100 * 1024 * 1024))
    except Exception:                      # pragma: no cover - conservative fallback
        vmem_limit = 32 * 1024 * 1024
    cparams = pltpu.CompilerParams(
        dimension_semantics=("parallel",),   # batch tiles are independent
        vmem_limit_bytes=vmem_limit,
    )

    # ---- channel-padded (lane-dense) weights & BN params --------------------
    w1p = jnp.pad(params["w1"], ((0, 0), (0, 0), (0, Cinp - Cin), (0, Cp - Cout)))
    w1_taps = w1p.reshape(9, Cinp, Cp).astype(mm)
    w2p = jnp.pad(params["w2"], ((0, 0), (0, 0), (0, Cp - Cout), (0, Cp - Cout)))
    w2_taps = w2p.reshape(9, Cp, Cp).astype(mm)
    g1 = jnp.pad(params["g1"], (0, Cp - Cout), constant_values=1.0)
    b1 = jnp.pad(params["b1"], (0, Cp - Cout))
    g2 = jnp.pad(params["g2"], (0, Cp - Cout), constant_values=1.0)
    b2 = jnp.pad(params["b2"], (0, Cp - Cout))

    # ---- conv1 input phases (no 9x / 2.25x HBM duplication) -----------------
    xc = jnp.pad(x, ((0, 0), (0, 0), (0, 0), (0, Cinp - Cin)))        # channel pad
    xpad = jnp.pad(xc, ((0, 0), (1, 1), (1, 1), (0, 0)))              # +1 spatial halo
    phases = []
    for ph in range(stride):
        for pw in range(stride):
            sl = xpad[:, ph::stride, pw::stride, :][:, :Hp, :Wp, :]
            pad_h, pad_w = Hp - sl.shape[1], Wp - sl.shape[2]
            if pad_h or pad_w:
                sl = jnp.pad(sl, ((0, 0), (0, pad_h), (0, pad_w), (0, 0)))
            phases.append(sl.astype(mm))

    # ---- specs ---------------------------------------------------------------
    phase_spec = pl.BlockSpec((nb, Hp, Wp, Cinp), lambda b: (b, 0, 0, 0))
    tile_spec = pl.BlockSpec((nb, Ho, Wo, Cp), lambda b: (b, 0, 0, 0))
    stat_spec = pl.BlockSpec((1, 2, Cp), lambda b: (b, 0, 0))
    vec_spec = pl.BlockSpec((1, Cp), lambda b: (0, 0))
    w1_spec = pl.BlockSpec((9, Cinp, Cp), lambda b: (0, 0, 0))
    w2_spec = pl.BlockSpec((9, Cp, Cp), lambda b: (0, 0, 0))

    tile_shape = jax.ShapeDtypeStruct((N, Ho, Wo, Cp), mm)     # bf16 intermediates
    stat_shape = jax.ShapeDtypeStruct((G, 2, Cp), jnp.float32)

    # ---------------- kernel A: conv1 (+ fused projection shortcut) ----------
    a_inputs = list(phases) + [w1_taps]
    a_in_specs = [phase_spec] * n_phase + [w1_spec]
    if has_proj:
        wsc_p = jnp.pad(params["wsc"],
                        ((0, 0), (0, 0), (0, Cinp - Cin), (0, Cp - Cout)))
        wsc_p = wsc_p.reshape(Cinp, Cp)
        w4cat = jnp.concatenate([w1p.reshape(9, Cinp, Cp)[4], wsc_p],
                                axis=-1).astype(mm)              # (Cinp, 2*Cp)
        a_inputs.append(w4cat)
        a_in_specs.append(pl.BlockSpec((Cinp, 2 * Cp), lambda b: (0, 0)))
        a_out_shape = (tile_shape, stat_shape, tile_shape, stat_shape)
        a_out_specs = (tile_spec, stat_spec, tile_spec, stat_spec)
    else:
        a_out_shape = (tile_shape, stat_shape)
        a_out_specs = (tile_spec, stat_spec)

    a_out = pl.pallas_call(
        _make_conv1_kernel(nb, Ho, Wo, Cinp, Cp, stride, has_proj),
        out_shape=a_out_shape,
        grid=(G,),
        in_specs=a_in_specs,
        out_specs=a_out_specs,
        compiler_params=cparams,
    )(*a_inputs)
    if has_proj:
        y1, st1, ysc, stsc = a_out
    else:
        y1, st1 = a_out

    # fold batch statistics + gamma/beta into per-channel (scale, bias) — tiny glue
    def _fold_bn(st, gamma, beta):
        s = jnp.sum(st[:, 0, :], axis=0)
        ss = jnp.sum(st[:, 1, :], axis=0)
        mean = s / nhw
        var = jnp.maximum(ss / nhw - mean * mean, 0.0)
        scale = gamma * jax.lax.rsqrt(var + _EPS)
        bias = beta - mean * scale
        return (scale.reshape(1, Cp).astype(jnp.float32),
                bias.reshape(1, Cp).astype(jnp.float32))

    scale1, bias1 = _fold_bn(st1, g1, b1)

    # ---------------- kernel B: bn1 + relu + conv2 ----------------------------
    y2, st2 = pl.pallas_call(
        _make_conv2_kernel(nb, Ho, Wo, Cp, mm),
        out_shape=(tile_shape, stat_shape),
        grid=(G,),
        in_specs=[tile_spec, vec_spec, vec_spec, w2_spec],
        out_specs=(tile_spec, stat_spec),
        scratch_shapes=[pltpu.VMEM((nb, Ho + 2, Wo + 2, Cp), mm)],
        compiler_params=cparams,
    )(y1, scale1, bias1, w2_taps)

    scale2, bias2 = _fold_bn(st2, g2, b2)

    # ---------------- kernel C: bn2 + shortcut + relu -------------------------
    out_shape = jax.ShapeDtypeStruct((N, Ho, Wo, Cp), jnp.float32)
    if has_proj:
        gsc = jnp.pad(params["gsc"], (0, Cp - Cout), constant_values=1.0)
        bsc = jnp.pad(params["bsc"], (0, Cp - Cout))
        scalesc, biassc = _fold_bn(stsc, gsc, bsc)
        c_inputs = [y2, ysc, scale2, bias2, scalesc, biassc]
        c_in_specs = [tile_spec, tile_spec, vec_spec, vec_spec, vec_spec, vec_spec]
    else:
        # identity shortcut (stride==1, Cin==Cout): channel-padded x in mm dtype
        c_inputs = [y2, xc.astype(mm), scale2, bias2]
        c_in_specs = [tile_spec, tile_spec, vec_spec, vec_spec]

    out = pl.pallas_call(
        _make_epilogue_kernel(nb, Ho, Wo, Cp, has_proj),
        out_shape=out_shape,
        grid=(G,),
        in_specs=c_in_specs,
        out_specs=tile_spec,
        compiler_params=cparams,
    )(*c_inputs)

    out = out[..., :Cout]                        # drop channel padding
    return jnp.transpose(out, (0, 3, 1, 2))      # back to NCHW


# ----------------------- plain-JAX reference (for checking) -----------------------
def reference_forward(x_nchw, p, stride):
    x = jnp.transpose(x_nchw, (0, 2, 3, 1)).astype(jnp.float32)

    def conv(x, w, s, pad):
        return jax.lax.conv_general_dilated(
            x, w, (s, s), pad, dimension_numbers=("NHWC", "HWIO", "NHWC"),
            precision=jax.lax.Precision.HIGHEST)

    def bn(x, g, b):
        m = jnp.mean(x, axis=(0, 1, 2), keepdims=True)
        v = jnp.mean((x - m) ** 2, axis=(0, 1, 2), keepdims=True)
        return (x - m) * jax.lax.rsqrt(v + _EPS) * g + b

    h = jax.nn.relu(bn(conv(x, p["w1"], stride, ((1, 1), (1, 1))), p["g1"], p["b1"]))
    h = bn(conv(h, p["w2"], 1, ((1, 1), (1, 1))), p["g2"], p["b2"])
    if "wsc" in p:
        sc = bn(conv(x, p["wsc"], stride, "VALID"), p["gsc"], p["bsc"])
    else:
        sc = x
    return jnp.transpose(jax.nn.relu(h + sc), (0, 3, 1, 2))


# ----------------------------- deterministic params -------------------------------
def init_params(key, cin, cout, stride):
    ks = jax.random.split(key, 7)
    f32 = jnp.float32
    p = {
        "w1": jax.random.normal(ks[0], (3, 3, cin, cout), f32) / (3 * 3 * cin) ** 0.5,
        "g1": 1.0 + 0.1 * jax.random.normal(ks[1], (cout,), f32),
        "b1": 0.1 * jax.random.normal(ks[2], (cout,), f32),
        "w2": jax.random.normal(ks[3], (3, 3, cout, cout), f32) / (3 * 3 * cout) ** 0.5,
        "g2": 1.0 + 0.1 * jax.random.normal(ks[4], (cout,), f32),
        "b2": 0.1 * jax.random.normal(ks[5], (cout,), f32),
    }
    if stride != 1 or cin != cout:
        p["wsc"] = jax.random.normal(ks[6], (1, 1, cin, cout), f32) / cin ** 0.5
        p["gsc"] = jnp.ones((cout,), f32)
        p["bsc"] = jnp.zeros((cout,), f32)
    return p


if __name__ == "__main__":
    key = jax.random.PRNGKey(0)
    kx, kp1, kp2 = jax.random.split(key, 3)
    x = jax.random.normal(kx, (2, 4, 16, 16), jnp.float32)   # NCHW like PyTorch

    # Case 1: projection shortcut (stride=2, 4 -> 8 channels)
    p1 = init_params(kp1, 4, 8, stride=2)
    ref1 = reference_forward(x, p1, stride=2)
    out1_f32 = basic_block_pallas(x, p1, 2, matmul_dtype=jnp.float32)
    jax.block_until_ready(out1_f32)
    assert out1_f32.shape == (2, 8, 8, 8), out1_f32.shape
    assert jnp.allclose(out1_f32, ref1, rtol=2e-3, atol=2e-3), "mismatch (proj, f32)"
    out1_bf16 = basic_block_pallas(x, p1, 2)                 # default bf16 matmuls
    jax.block_until_ready(out1_bf16)
    assert jnp.allclose(out1_bf16, ref1, rtol=5e-2, atol=5e-2), "mismatch (proj, bf16)"

    # Case 2: identity shortcut (stride=1, 4 -> 4 channels)
    p2 = init_params(kp2, 4, 4, stride=1)
    ref2 = reference_forward(x, p2, stride=1)
    out2_f32 = basic_block_pallas(x, p2, 1, matmul_dtype=jnp.float32)
    jax.block_until_ready(out2_f32)
    assert out2_f32.shape == (2, 4, 16, 16), out2_f32.shape
    assert jnp.allclose(out2_f32, ref2, rtol=2e-3, atol=2e-3), "mismatch (identity, f32)"
    out2_bf16 = basic_block_pallas(x, p2, 1)
    jax.block_until_ready(out2_bf16)
    assert jnp.allclose(out2_bf16, ref2, rtol=5e-2, atol=5e-2), "mismatch (identity, bf16)"

    print("KERNEL_OK")
</pallas_src>

<mosaic_0001>
module attributes {stable_mosaic.version = 11 : i64} {
  func.func @kernel(%arg0: i32, %arg1: memref<2x9x9x128xf32, #tpu.memory_space<vmem>>, %arg2: memref<2x9x9x128xf32, #tpu.memory_space<vmem>>, %arg3: memref<2x9x9x128xf32, #tpu.memory_space<vmem>>, %arg4: memref<2x9x9x128xf32, #tpu.memory_space<vmem>>, %arg5: memref<9x128x128xf32, #tpu.memory_space<vmem>>, %arg6: memref<128x256xf32, #tpu.memory_space<vmem>>, %arg7: memref<2x8x8x128xf32, #tpu.memory_space<vmem>>, %arg8: memref<1x2x128xf32, #tpu.memory_space<vmem>>, %arg9: memref<2x8x8x128xf32, #tpu.memory_space<vmem>>, %arg10: memref<1x2x128xf32, #tpu.memory_space<vmem>>) attributes {dimension_semantics = [#tpu.dimension_semantics<parallel>], iteration_bounds = array<i64: 1>, scalar_prefetch = 0 : i64, scratch_operands = 0 : i64, tpu.core_type = #tpu.core_type<tc>, window_params = [{transform_indices = @transform_0, window_bounds = array<i64: 2, 9, 9, 128>}, {transform_indices = @transform_1, window_bounds = array<i64: 2, 9, 9, 128>}, {transform_indices = @transform_2, window_bounds = array<i64: 2, 9, 9, 128>}, {transform_indices = @transform_3, window_bounds = array<i64: 2, 9, 9, 128>}, {pipeline_mode = #tpu.pipeline_mode<synchronous>, transform_indices = @transform_4, window_bounds = array<i64: 9, 128, 128>}, {pipeline_mode = #tpu.pipeline_mode<synchronous>, transform_indices = @transform_5, window_bounds = array<i64: 128, 256>}, {transform_indices = @transform_6, window_bounds = array<i64: 2, 8, 8, 128>}, {transform_indices = @transform_7, window_bounds = array<i64: 1, 2, 128>}, {transform_indices = @transform_8, window_bounds = array<i64: 2, 8, 8, 128>}, {transform_indices = @transform_9, window_bounds = array<i64: 1, 2, 128>}]} {
    %c0 = arith.constant 0 : index
    %c0_0 = arith.constant 0 : index
    %c0_1 = arith.constant 0 : index
    %c0_2 = arith.constant 0 : index
    %0 = vector.load %arg1[%c0, %c0_0, %c0_1, %c0_2] : memref<2x9x9x128xf32, #tpu.memory_space<vmem>>, vector<2x8x8x128xf32>
    %1 = vector.shape_cast %0 : vector<2x8x8x128xf32> to vector<128x128xf32>
    %c0_3 = arith.constant 0 : index
    %c0_4 = arith.constant 0 : index
    %c0_5 = arith.constant 0 : index
    %2 = vector.load %arg5[%c0_3, %c0_4, %c0_5] : memref<9x128x128xf32, #tpu.memory_space<vmem>>, vector<1x128x128xf32>
    %3 = vector.shape_cast %2 : vector<1x128x128xf32> to vector<128x128xf32>
    %cst = arith.constant dense<0.000000e+00> : vector<128x128xf32>
    %4 = tpu.matmul %1, %3, %cst {dimension_numbers = #tpu.dot_dimension_numbers<[1], [0], [0], [1], [0, 0, 1, 1], [], []>} : vector<128x128xf32>, vector<128x128xf32>, vector<128x128xf32> -> vector<128x128xf32>
    %c0_6 = arith.constant 0 : index
    %c0_7 = arith.constant 0 : index
    %c0_8 = arith.constant 0 : index
    %c0_9 = arith.constant 0 : index
    %5 = vector.load %arg2[%c0_6, %c0_7, %c0_8, %c0_9] : memref<2x9x9x128xf32, #tpu.memory_space<vmem>>, vector<2x8x8x128xf32>
    %6 = vector.shape_cast %5 : vector<2x8x8x128xf32> to vector<128x128xf32>
    %c1 = arith.constant 1 : index
    %c0_10 = arith.constant 0 : index
    %c0_11 = arith.constant 0 : index
    %7 = vector.load %arg5[%c1, %c0_10, %c0_11] : memref<9x128x128xf32, #tpu.memory_space<vmem>>, vector<1x128x128xf32>
    %8 = vector.shape_cast %7 : vector<1x128x128xf32> to vector<128x128xf32>
    %cst_12 = arith.constant dense<0.000000e+00> : vector<128x128xf32>
    %9 = tpu.matmul %6, %8, %cst_12 {dimension_numbers = #tpu.dot_dimension_numbers<[1], [0], [0], [1], [0, 0, 1, 1], [], []>} : vector<128x128xf32>, vector<128x128xf32>, vector<128x128xf32> -> vector<128x128xf32>
    %10 = arith.addf %4, %9 : vector<128x128xf32>
    %c0_13 = arith.constant 0 : index
    %c0_14 = arith.constant 0 : index
    %c1_15 = arith.constant 1 : index
    %c0_16 = arith.constant 0 : index
    %11 = vector.load %arg1[%c0_13, %c0_14, %c1_15, %c0_16] : memref<2x9x9x128xf32, #tpu.memory_space<vmem>>, vector<2x8x8x128xf32>
    %12 = vector.shape_cast %11 : vector<2x8x8x128xf32> to vector<128x128xf32>
    %c2 = arith.constant 2 : index
    %c0_17 = arith.constant 0 : index
    %c0_18 = arith.constant 0 : index
    %13 = vector.load %arg5[%c2, %c0_17, %c0_18] : memref<9x128x128xf32, #tpu.memory_space<vmem>>, vector<1x128x128xf32>
    %14 = vector.shape_cast %13 : vector<1x128x128xf32> to vector<128x128xf32>
    %cst_19 = arith.constant dense<0.000000e+00> : vector<128x128xf32>
    %15 = tpu.matmul %12, %14, %cst_19 {dimension_numbers = #tpu.dot_dimension_numbers<[1], [0], [0], [1], [0, 0, 1, 1], [], []>} : vector<128x128xf32>, vector<128x128xf32>, vector<128x128xf32> -> vector<128x128xf32>
    %16 = arith.addf %10, %15 : vector<128x128xf32>
    %c0_20 = arith.constant 0 : index
    %c0_21 = arith.constant 0 : index
    %c0_22 = arith.constant 0 : index
    %c0_23 = arith.constant 0 : index
    %17 = vector.load %arg3[%c0_20, %c0_21, %c0_22, %c0_23] : memref<2x9x9x128xf32, #tpu.memory_space<vmem>>, vector<2x8x8x128xf32>
    %18 = vector.shape_cast %17 : vector<2x8x8x128xf32> to vector<128x128xf32>
    %c3 = arith.constant 3 : index
    %c0_24 = arith.constant 0 : index
    %c0_25 = arith.constant 0 : index
    %19 = vector.load %arg5[%c3, %c0_24, %c0_25] : memref<9x128x128xf32, #tpu.memory_space<vmem>>, vector<1x128x128xf32>
    %20 = vector.shape_cast %19 : vector<1x128x128xf32> to vector<128x128xf32>
    %cst_26 = arith.constant dense<0.000000e+00> : vector<128x128xf32>
    %21 = tpu.matmul %18, %20, %cst_26 {dimension_numbers = #tpu.dot_dimension_numbers<[1], [0], [0], [1], [0, 0, 1, 1], [], []>} : vector<128x128xf32>, vector<128x128xf32>, vector<128x128xf32> -> vector<128x128xf32>
    %22 = arith.addf %16, %21 : vector<128x128xf32>
    %c0_27 = arith.constant 0 : index
    %c0_28 = arith.constant 0 : index
    %c0_29 = arith.constant 0 : index
    %c0_30 = arith.constant 0 : index
    %23 = vector.load %arg4[%c0_27, %c0_28, %c0_29, %c0_30] : memref<2x9x9x128xf32, #tpu.memory_space<vmem>>, vector<2x8x8x128xf32>
    %24 = vector.shape_cast %23 : vector<2x8x8x128xf32> to vector<128x128xf32>
    %c0_31 = arith.constant 0 : index
    %c0_32 = arith.constant 0 : index
    %25 = vector.load %arg6[%c0_31, %c0_32] : memref<128x256xf32, #tpu.memory_space<vmem>>, vector<128x256xf32>
    %cst_33 = arith.constant dense<0.000000e+00> : vector<128x256xf32>
    %26 = tpu.matmul %24, %25, %cst_33 {dimension_numbers = #tpu.dot_dimension_numbers<[1], [0], [0], [1], [0, 0, 1, 1], [], []>} : vector<128x128xf32>, vector<128x256xf32>, vector<128x256xf32> -> vector<128x256xf32>
    %27 = vector.extract_strided_slice %26 {offsets = [0, 0], sizes = [128, 128], strides = [1, 1]} : vector<128x256xf32> to vector<128x128xf32>
    %28 = vector.extract_strided_slice %26 {offsets = [0, 128], sizes = [128, 128], strides = [1, 1]} : vector<128x256xf32> to vector<128x128xf32>
    %29 = arith.addf %22, %27 : vector<128x128xf32>
    %c0_34 = arith.constant 0 : index
    %c0_35 = arith.constant 0 : index
    %c1_36 = arith.constant 1 : index
    %c0_37 = arith.constant 0 : index
    %30 = vector.load %arg3[%c0_34, %c0_35, %c1_36, %c0_37] : memref<2x9x9x128xf32, #tpu.memory_space<vmem>>, vector<2x8x8x128xf32>
    %31 = vector.shape_cast %30 : vector<2x8x8x128xf32> to vector<128x128xf32>
    %c5 = arith.constant 5 : index
    %c0_38 = arith.constant 0 : index
    %c0_39 = arith.constant 0 : index
    %32 = vector.load %arg5[%c5, %c0_38, %c0_39] : memref<9x128x128xf32, #tpu.memory_space<vmem>>, vector<1x128x128xf32>
    %33 = vector.shape_cast %32 : vector<1x128x128xf32> to vector<128x128xf32>
    %cst_40 = arith.constant dense<0.000000e+00> : vector<128x128xf32>
    %34 = tpu.matmul %31, %33, %cst_40 {dimension_numbers = #tpu.dot_dimension_numbers<[1], [0], [0], [1], [0, 0, 1, 1], [], []>} : vector<128x128xf32>, vector<128x128xf32>, vector<128x128xf32> -> vector<128x128xf32>
    %35 = arith.addf %29, %34 : vector<128x128xf32>
    %c0_41 = arith.constant 0 : index
    %c1_42 = arith.constant 1 : index
    %c0_43 = arith.constant 0 : index
    %c0_44 = arith.constant 0 : index
    %36 = vector.load %arg1[%c0_41, %c1_42, %c0_43, %c0_44] : memref<2x9x9x128xf32, #tpu.memory_space<vmem>>, vector<2x8x8x128xf32>
    %37 = vector.shape_cast %36 : vector<2x8x8x128xf32> to vector<128x128xf32>
    %c6 = arith.constant 6 : index
    %c0_45 = arith.constant 0 : index
    %c0_46 = arith.constant 0 : index
    %38 = vector.load %arg5[%c6, %c0_45, %c0_46] : memref<9x128x128xf32, #tpu.memory_space<vmem>>, vector<1x128x128xf32>
    %39 = vector.shape_cast %38 : vector<1x128x128xf32> to vector<128x128xf32>
    %cst_47 = arith.constant dense<0.000000e+00> : vector<128x128xf32>
    %40 = tpu.matmul %37, %39, %cst_47 {dimension_numbers = #tpu.dot_dimension_numbers<[1], [0], [0], [1], [0, 0, 1, 1], [], []>} : vector<128x128xf32>, vector<128x128xf32>, vector<128x128xf32> -> vector<128x128xf32>
    %41 = arith.addf %35, %40 : vector<128x128xf32>
    %c0_48 = arith.constant 0 : index
    %c1_49 = arith.constant 1 : index
    %c0_50 = arith.constant 0 : index
    %c0_51 = arith.constant 0 : index
    %42 = vector.load %arg2[%c0_48, %c1_49, %c0_50, %c0_51] : memref<2x9x9x128xf32, #tpu.memory_space<vmem>>, vector<2x8x8x128xf32>
    %43 = vector.shape_cast %42 : vector<2x8x8x128xf32> to vector<128x128xf32>
    %c7 = arith.constant 7 : index
    %c0_52 = arith.constant 0 : index
    %c0_53 = arith.constant 0 : index
    %44 = vector.load %arg5[%c7, %c0_52, %c0_53] : memref<9x128x128xf32, #tpu.memory_space<vmem>>, vector<1x128x128xf32>
    %45 = vector.shape_cast %44 : vector<1x128x128xf32> to vector<128x128xf32>
    %cst_54 = arith.constant dense<0.000000e+00> : vector<128x128xf32>
    %46 = tpu.matmul %43, %45, %cst_54 {dimension_numbers = #tpu.dot_dimension_numbers<[1], [0], [0], [1], [0, 0, 1, 1], [], []>} : vector<128x128xf32>, vector<128x128xf32>, vector<128x128xf32> -> vector<128x128xf32>
    %47 = arith.addf %41, %46 : vector<128x128xf32>
    %c0_55 = arith.constant 0 : index
    %c1_56 = arith.constant 1 : index
    %c1_57 = arith.constant 1 : index
    %c0_58 = arith.constant 0 : index
    %48 = vector.load %arg1[%c0_55, %c1_56, %c1_57, %c0_58] : memref<2x9x9x128xf32, #tpu.memory_space<vmem>>, vector<2x8x8x128xf32>
    %49 = vector.shape_cast %48 : vector<2x8x8x128xf32> to vector<128x128xf32>
    %c8 = arith.constant 8 : index
    %c0_59 = arith.constant 0 : index
    %c0_60 = arith.constant 0 : index
    %50 = vector.load %arg5[%c8, %c0_59, %c0_60] : memref<9x128x128xf32, #tpu.memory_space<vmem>>, vector<1x128x128xf32>
    %51 = vector.shape_cast %50 : vector<1x128x128xf32> to vector<128x128xf32>
    %cst_61 = arith.constant dense<0.000000e+00> : vector<128x128xf32>
    %52 = tpu.matmul %49, %51, %cst_61 {dimension_numbers = #tpu.dot_dimension_numbers<[1], [0], [0], [1], [0, 0, 1, 1], [], []>} : vector<128x128xf32>, vector<128x128xf32>, vector<128x128xf32> -> vector<128x128xf32>
    %53 = arith.addf %47, %52 : vector<128x128xf32>
    %54 = vector.shape_cast %53 : vector<128x128xf32> to vector<2x8x8x128xf32>
    %c0_62 = arith.constant 0 : index
    %c0_63 = arith.constant 0 : index
    %c0_64 = arith.constant 0 : index
    %c0_65 = arith.constant 0 : index
    %55 = vector.load %arg7[%c0_62, %c0_63, %c0_64, %c0_65] : memref<2x8x8x128xf32, #tpu.memory_space<vmem>>, vector<2x8x8x128xf32>
    tpu.vector_store %arg7[%c0_62, %c0_63, %c0_64, %c0_65], %54 {strides = array<i32>} : memref<2x8x8x128xf32, #tpu.memory_space<vmem>>, vector<2x8x8x128xf32>,
    %cst_66 = arith.constant dense<0.000000e+00> : vector<128xf32>
    %56 = vector.multi_reduction <add>, %53, %cst_66 [0] : vector<128x128xf32> to vector<128xf32>
    %57 = vector.shape_cast %56 : vector<128xf32> to vector<1x128xf32>
    %58 = arith.mulf %53, %53 : vector<128x128xf32>
    %cst_67 = arith.constant dense<0.000000e+00> : vector<128xf32>
    %59 = vector.multi_reduction <add>, %58, %cst_67 [0] : vector<128x128xf32> to vector<128xf32>
    %60 = vector.shape_cast %59 : vector<128xf32> to vector<1x128xf32>
    %61 = tpu.concatenate %57, %60 in 0 : vector<1x128xf32>, vector<1x128xf32> -> vector<2x128xf32>
    %62 = vector.shape_cast %61 : vector<2x128xf32> to vector<1x2x128xf32>
    %c0_68 = arith.constant 0 : index
    %c0_69 = arith.constant 0 : index
    %c0_70 = arith.constant 0 : index
    %63 = vector.load %arg8[%c0_68, %c0_69, %c0_70] : memref<1x2x128xf32, #tpu.memory_space<vmem>>, vector<1x2x128xf32>
    tpu.vector_store %arg8[%c0_68, %c0_69, %c0_70], %62 {strides = array<i32>} : memref<1x2x128xf32, #tpu.memory_space<vmem>>, vector<1x2x128xf32>,
    %64 = vector.shape_cast %28 : vector<128x128xf32> to vector<2x8x8x128xf32>
    %c0_71 = arith.constant 0 : index
    %c0_72 = arith.constant 0 : index
    %c0_73 = arith.constant 0 : index
    %c0_74 = arith.constant 0 : index
    %65 = vector.load %arg9[%c0_71, %c0_72, %c0_73, %c0_74] : memref<2x8x8x128xf32, #tpu.memory_space<vmem>>, vector<2x8x8x128xf32>
    tpu.vector_store %arg9[%c0_71, %c0_72, %c0_73, %c0_74], %64 {strides = array<i32>} : memref<2x8x8x128xf32, #tpu.memory_space<vmem>>, vector<2x8x8x128xf32>,
    %cst_75 = arith.constant dense<0.000000e+00> : vector<128xf32>
    %66 = vector.multi_reduction <add>, %28, %cst_75 [0] : vector<128x128xf32> to vector<128xf32>
    %67 = vector.shape_cast %66 : vector<128xf32> to vector<1x128xf32>
    %68 = arith.mulf %28, %28 : vector<128x128xf32>
    %cst_76 = arith.constant dense<0.000000e+00> : vector<128xf32>
    %69 = vector.multi_reduction <add>, %68, %cst_76 [0] : vector<128x128xf32> to vector<128xf32>
    %70 = vector.shape_cast %69 : vector<128xf32> to vector<1x128xf32>
    %71 = tpu.concatenate %67, %70 in 0 : vector<1x128xf32>, vector<1x128xf32> -> vector<2x128xf32>
    %72 = vector.shape_cast %71 : vector<2x128xf32> to vector<1x2x128xf32>
    %c0_77 = arith.constant 0 : index
    %c0_78 = arith.constant 0 : index
    %c0_79 = arith.constant 0 : index
    %73 = vector.load %arg10[%c0_77, %c0_78, %c0_79] : memref<1x2x128xf32, #tpu.memory_space<vmem>>, vector<1x2x128xf32>
    tpu.vector_store %arg10[%c0_77, %c0_78, %c0_79], %72 {strides = array<i32>} : memref<1x2x128xf32, #tpu.memory_space<vmem>>, vector<1x2x128xf32>,
    return
  }
  func.func @transform_0(%arg0: i32) -> (i32, i32, i32, i32) {
    %c0_i32 = arith.constant 0 : i32
    %c0_i32_0 = arith.constant 0 : i32
    %c0_i32_1 = arith.constant 0 : i32
    %c0_i32_2 = arith.constant 0 : i32
    return %arg0, %c0_i32, %c0_i32_0, %c0_i32_1 : i32, i32, i32, i32
  }
  func.func @transform_1(%arg0: i32) -> (i32, i32, i32, i32) {
    %c0_i32 = arith.constant 0 : i32
    %c0_i32_0 = arith.constant 0 : i32
    %c0_i32_1 = arith.constant 0 : i32
    %c0_i32_2 = arith.constant 0 : i32
    return %arg0, %c0_i32, %c0_i32_0, %c0_i32_1 : i32, i32, i32, i32
  }
  func.func @transform_2(%arg0: i32) -> (i32, i32, i32, i32) {
    %c0_i32 = arith.constant 0 : i32
    %c0_i32_0 = arith.constant 0 : i32
    %c0_i32_1 = arith.constant 0 : i32
    %c0_i32_2 = arith.constant 0 : i32
    return %arg0, %c0_i32, %c0_i32_0, %c0_i32_1 : i32, i32, i32, i32
  }
  func.func @transform_3(%arg0: i32) -> (i32, i32, i32, i32) {
    %c0_i32 = arith.constant 0 : i32
    %c0_i32_0 = arith.constant 0 : i32
    %c0_i32_1 = arith.constant 0 : i32
    %c0_i32_2 = arith.constant 0 : i32
    return %arg0, %c0_i32, %c0_i32_0, %c0_i32_1 : i32, i32, i32, i32
  }
  func.func @transform_4(%arg0: i32) -> (i32, i32, i32) {
    %c0_i32 = arith.constant 0 : i32
    %c0_i32_0 = arith.constant 0 : i32
    %c0_i32_1 = arith.constant 0 : i32
    %c0_i32_2 = arith.constant 0 : i32
    return %c0_i32, %c0_i32_0, %c0_i32_1 : i32, i32, i32
  }
  func.func @transform_5(%arg0: i32) -> (i32, i32) {
    %c0_i32 = arith.constant 0 : i32
    %c0_i32_0 = arith.constant 0 : i32
    %c0_i32_1 = arith.constant 0 : i32
    return %c0_i32, %c0_i32_0 : i32, i32
  }
  func.func @transform_6(%arg0: i32) -> (i32, i32, i32, i32) {
    %c0_i32 = arith.constant 0 : i32
    %c0_i32_0 = arith.constant 0 : i32
    %c0_i32_1 = arith.constant 0 : i32
    %c0_i32_2 = arith.constant 0 : i32
    return %arg0, %c0_i32, %c0_i32_0, %c0_i32_1 : i32, i32, i32, i32
  }
  func.func @transform_7(%arg0: i32) -> (i32, i32, i32) {
    %c0_i32 = arith.constant 0 : i32
    %c0_i32_0 = arith.constant 0 : i32
    %c0_i32_1 = arith.constant 0 : i32
    return %arg0, %c0_i32, %c0_i32_0 : i32, i32, i32
  }
  func.func @transform_8(%arg0: i32) -> (i32, i32, i32, i32) {
    %c0_i32 = arith.constant 0 : i32
    %c0_i32_0 = arith.constant 0 : i32
    %c0_i32_1 = arith.constant 0 : i32
    %c0_i32_2 = arith.constant 0 : i32
    return %arg0, %c0_i32, %c0_i32_0, %c0_i32_1 : i32, i32, i32, i32
  }
  func.func @transform_9(%arg0: i32) -> (i32, i32, i32) {
    %c0_i32 = arith.constant 0 : i32
    %c0_i32_0 = arith.constant 0 : i32
    %c0_i32_1 = arith.constant 0 : i32
    return %arg0, %c0_i32, %c0_i32_0 : i32, i32, i32
  }
}

</mosaic_0001>

<bundles_post_ra>
// kernel: tpu_custom_call.1
= control target key start
LH: loop header
LB: loop body
LE: loop exit
PB: predicated region body
PF: predicated region fallthrough
CT: control target
= control target key end

     0   :  { %15 = vsyncpa [#allocation3], 0  ;;  %s4175_s0 = inlined_call_operand.vmem [shape: f32[2,9,9,128], index: 0, kind: input, shape index: {}]   ;;  %s4176_s1 = inlined_call_operand.vmem [shape: f32[2,9,9,128], index: 1, kind: input, shape index: {}]   ;;  %s4177_s2 = inlined_call_operand.vmem [shape: f32[2,9,9,128], index: 2, kind: input, shape index: {}]   ;;  %s4178_s3 = inlined_call_operand.vmem [shape: f32[2,9,9,128], index: 3, kind: input, shape index: {}]   ;;  %s4179_s4 = inlined_call_operand.vmem [shape: f32[9,128,128], index: 4, kind: input, shape index: {}]   ;;  %s4180_s5 = inlined_call_operand.vmem [shape: f32[128,256], index: 5, kind: input, shape index: {}]   ;;  %s4181_s6 = inlined_call_operand.hbm [shape: f32[2,8,8,128], index: 6, kind: output, shape index: {0}]   ;;  %s4182_s7 = inlined_call_operand.hbm [shape: f32[1,2,128], index: 7, kind: output, shape index: {1}]   ;;  %s4183_s8 = inlined_call_operand.hbm [shape: f32[2,8,8,128], index: 8, kind: output, shape index: {2}]   ;;  %s4184_s9 = inlined_call_operand.hbm [shape: f32[1,2,128], index: 9, kind: output, shape index: {3}]  }
   0x1   :  { %16 = vsyncpa [#allocation5], 0  ;;  %v2003_v0 = vld [vmem:[%s4179_s4 + $0xf8] sm:$0xff]  ;;  %v2002_v2 = vld [vmem:[%s4179_s4 + $0xf0] sm:$0xff] }
   0x2   :  { %v61_v1 = vld [vmem:[%s4179_s4 + $0x78] sm:$0xff]  ;;  %2404 = vmatprep.subr.mxu0 %v2003_v0  ;;  %v60_v3 = vld [vmem:[%s4179_s4 + $0x70] sm:$0xff]  ;;  %v2001_v4 = vld [vmem:[%s4179_s4 + $0xe8] sm:$0xff] }
   0x3   :  { %2460 = vmatprep.subr.mxu1 %v61_v1  ;;  %2405 = vmatpush3.msra.mxu0 %v2003_v0  ;;  %v59_v5 = vld [vmem:[%s4179_s4 + $0x68] sm:$0xff]  ;;  %v2000_v6 = vld [vmem:[%s4179_s4 + $0xe0] sm:$0xff]  ;;  %v1999_v8 = vld [vmem:[%s4179_s4 + $0xd8] sm:$0xff] }
   0x4   :  { %2461 = vmatpush3.msra.mxu1 %v61_v1  ;;  %2406 = vmatprep.subr.mxu0 %v2002_v2  ;;  %v58_v7 = vld [vmem:[%s4179_s4 + $0x60] sm:$0xff]  ;;  %v57_v9 = vld [vmem:[%s4179_s4 + $0x58] sm:$0xff]  ;;  %v1998_v10 = vld [vmem:[%s4179_s4 + $0xd0] sm:$0xff] }
   0x5   :  { %2462 = vmatprep.subr.mxu1 %v60_v3  ;;  %2407 = vmatpush3.msra.mxu0 %v2002_v2  ;;  %v56_v11 = vld [vmem:[%s4179_s4 + $0x50] sm:$0xff]  ;;  %v1997_v12 = vld [vmem:[%s4179_s4 + $0xc8] sm:$0xff]  ;;  %v1996_v14 = vld [vmem:[%s4179_s4 + $0xc0] sm:$0xff] }
   0x6   :  { %2463 = vmatpush3.msra.mxu1 %v60_v3  ;;  %2408 = vmatprep.subr.mxu0 %v2001_v4  ;;  %v55_v13 = vld [vmem:[%s4179_s4 + $0x48] sm:$0xff]  ;;  %v54_v15 = vld [vmem:[%s4179_s4 + $0x40] sm:$0xff]  ;;  %v1995_v16 = vld [vmem:[%s4179_s4 + $0xb8] sm:$0xff] }
   0x7   :  { %2464 = vmatprep.subr.mxu1 %v59_v5  ;;  %2409 = vmatpush3.msra.mxu0 %v2001_v4  ;;  %v53_v17 = vld [vmem:[%s4179_s4 + $0x38] sm:$0xff]  ;;  %v1994_v18 = vld [vmem:[%s4179_s4 + $0xb0] sm:$0xff]  ;;  %v1993_v20 = vld [vmem:[%s4179_s4 + $0xa8] sm:$0xff] }
   0x8   :  { %2465 = vmatpush3.msra.mxu1 %v59_v5  ;;  %2410 = vmatprep.subr.mxu0 %v2000_v6  ;;  %v52_v19 = vld [vmem:[%s4179_s4 + $0x30] sm:$0xff]  ;;  %v51_v21 = vld [vmem:[%s4179_s4 + $0x28] sm:$0xff]  ;;  %v1992_v22 = vld [vmem:[%s4179_s4 + $0xa0] sm:$0xff] }
   0x9   :  { %2466 = vmatprep.subr.mxu1 %v58_v7  ;;  %2411 = vmatpush3.msra.mxu0 %v2000_v6  ;;  %v50_v23 = vld [vmem:[%s4179_s4 + $0x20] sm:$0xff]  ;;  %v1991_v24 = vld [vmem:[%s4179_s4 + $0x98] sm:$0xff]  ;;  %v1990_v26 = vld [vmem:[%s4179_s4 + $0x90] sm:$0xff] }
   0xa   :  { %2467 = vmatpush3.msra.mxu1 %v58_v7  ;;  %2412 = vmatprep.subr.mxu0 %v1999_v8  ;;  %v49_v25 = vld [vmem:[%s4179_s4 + $0x18] sm:$0xff]  ;;  %v48_v27 = vld [vmem:[%s4179_s4 + $0x10] sm:$0xff]  ;;  %v1989_v28 = vld [vmem:[%s4179_s4 + $0x88] sm:$0xff] }
   0xb   :  { %2468 = vmatprep.subr.mxu1 %v57_v9  ;;  %2413 = vmatpush3.msra.mxu0 %v1999_v8  ;;  %v47_v29 = vld [vmem:[%s4179_s4 + $0x8] sm:$0xff]  ;;  %v1988_v30 = vld [vmem:[%s4179_s4 + $0x80] sm:$0xff]  ;;  %v63_v34 = vld [vmem:[%s4176_s1 + $0x10] sm:$0xff] }
   0xc   :  { %2469 = vmatpush3.msra.mxu1 %v57_v9  ;;  %2414 = vmatprep.subr.mxu0 %v1998_v10  ;;  %v46_v31 = vld [vmem:[%s4179_s4] sm:$0xff]  ;;  %v3110_v35 = vld [vmem:[%s4175_s0 + $0x10] sm:$0xff]  ;;  %v2019_v36 = vld [vmem:[%s4179_s4 + $0x178] sm:$0xff] }
   0xd   :  { %2470 = vmatprep.subr.mxu1 %v56_v11  ;;  %2415 = vmatpush3.msra.mxu0 %v1998_v10  ;;  %v62_v32 = vld [vmem:[%s4176_s1] sm:$0xff]  ;;  %v2035_v37 = vld [vmem:[%s4179_s4 + $0x1f8] sm:$0xff]  ;;  %v2018_v38 = vld [vmem:[%s4179_s4 + $0x170] sm:$0xff] }
   0xe   :  { %2471 = vmatpush3.msra.mxu1 %v56_v11  ;;  %2416 = vmatprep.subr.mxu0 %v1997_v12  ;;  %v30_v33 = vld [vmem:[%s4175_s0] sm:$0xff]  ;;  %v2034_v39 = vld [vmem:[%s4179_s4 + $0x1f0] sm:$0xff]  ;;  %v2017_v44 = vld [vmem:[%s4179_s4 + $0x168] sm:$0xff] }
   0xf   :  { %2472 = vmatprep.subr.mxu1 %v55_v13  ;;  %2417 = vmatpush3.msra.mxu0 %v1997_v12  ;;  %v64_v40 = vld [vmem:[%s4176_s1 + $0x20] sm:$0xff]  ;;  %v65_v42 = vld [vmem:[%s4176_s1 + $0x30] sm:$0xff]  ;;  %v2033_v45 = vld [vmem:[%s4179_s4 + $0x1e8] sm:$0xff] }
  0x10   :  { %2473 = vmatpush3.msra.mxu1 %v55_v13  ;;  %2418 = vmatprep.subr.mxu0 %v1996_v14  ;;  %v3131_v41 = vld [vmem:[%s4175_s0 + $0x20] sm:$0xff]  ;;  %v3139_v43 = vld [vmem:[%s4175_s0 + $0x30] sm:$0xff]  ;;  %v2015_v52 = vld [vmem:[%s4179_s4 + $0x158] sm:$0xff] }
  0x11   :  { %2474 = vmatprep.subr.mxu1 %v54_v15  ;;  %2419 = vmatpush3.msra.mxu0 %v1996_v14  ;;  %v2016_v46 = vld [vmem:[%s4179_s4 + $0x160] sm:$0xff]  ;;  %v67_v50 = vld [vmem:[%s4176_s1 + $0x50] sm:$0xff]  ;;  %v2031_v53 = vld [vmem:[%s4179_s4 + $0x1d8] sm:$0xff] }
  0x12   :  { %2475 = vmatpush3.msra.mxu1 %v54_v15  ;;  %2420 = vmatprep.subr.mxu0 %v1995_v16  ;;  %v2032_v47 = vld [vmem:[%s4179_s4 + $0x1e0] sm:$0xff]  ;;  %v3169_v51 = vld [vmem:[%s4175_s0 + $0x50] sm:$0xff]  ;;  %v2013_v60 = vld [vmem:[%s4179_s4 + $0x148] sm:$0xff] }
  0x13   :  { %2476 = vmatprep.subr.mxu1 %v53_v17  ;;  %2421 = vmatpush3.msra.mxu0 %v1995_v16  ;;  %v66_v48 = vld [vmem:[%s4176_s1 + $0x40] sm:$0xff]  ;;  %v2014_v54 = vld [vmem:[%s4179_s4 + $0x150] sm:$0xff]  ;;  %v2029_v61 = vld [vmem:[%s4179_s4 + $0x1c8] sm:$0xff] }
  0x14   :  { %2477 = vmatpush3.msra.mxu1 %v53_v17  ;;  %2422 = vmatprep.subr.mxu0 %v1994_v18  ;;  %v3161_v49 = vld [vmem:[%s4175_s0 + $0x40] sm:$0xff]  ;;  %v2030_v55 = vld [vmem:[%s4179_s4 + $0x1d0] sm:$0xff]  ;;  %v2011_v4 = vld [vmem:[%s4179_s4 + $0x138] sm:$0xff] }
  0x15   :  { %2478 = vmatprep.subr.mxu1 %v52_v19  ;;  %2423 = vmatpush3.msra.mxu0 %v1994_v18  ;;  %v68_v56 = vld [vmem:[%s4176_s1 + $0x60] sm:$0xff]  ;;  %v69_v58 = vld [vmem:[%s4176_s1 + $0x70] sm:$0xff]  ;;  %v2027_v5 = vld [vmem:[%s4179_s4 + $0x1b8] sm:$0xff] }
  0x16   :  { %2479 = vmatpush3.msra.mxu1 %v52_v19  ;;  %2424 = vmatprep.subr.mxu0 %v1993_v20  ;;  %v3191_v57 = vld [vmem:[%s4175_s0 + $0x60] sm:$0xff]  ;;  %v3199_v59 = vld [vmem:[%s4175_s0 + $0x70] sm:$0xff]  ;;  %v2009_v12 = vld [vmem:[%s4179_s4 + $0x128] sm:$0xff] }
  0x17   :  { %2480 = vmatprep.subr.mxu1 %v51_v21  ;;  %2425 = vmatpush3.msra.mxu0 %v1993_v20  ;;  %v2012_v62 = vld [vmem:[%s4179_s4 + $0x140] sm:$0xff]  ;;  %v70_v0 = vld [vmem:[%s4176_s1 + $0x90] sm:$0xff]  ;;  %v2025_v13 = vld [vmem:[%s4179_s4 + $0x1a8] sm:$0xff] }
  0x18   :  { %2481 = vmatpush3.msra.mxu1 %v51_v21  ;;  %2426 = vmatprep.subr.mxu0 %v1992_v22  ;;  %v2028_v63 = vld [vmem:[%s4179_s4 + $0x1c0] sm:$0xff]  ;;  %v38_v1 = vld [vmem:[%s4175_s0 + $0x90] sm:$0xff]  ;;  %v2007_v20 = vld [vmem:[%s4179_s4 + $0x118] sm:$0xff] }
  0x19   :  { %2482 = vmatprep.subr.mxu1 %v50_v23  ;;  %2427 = vmatpush3.msra.mxu0 %v1992_v22  ;;  %v71_v2 = vld [vmem:[%s4176_s1 + $0xa0] sm:$0xff]  ;;  %v2010_v6 = vld [vmem:[%s4179_s4 + $0x130] sm:$0xff]  ;;  %v2023_v21 = vld [vmem:[%s4179_s4 + $0x198] sm:$0xff] }
  0x1a   :  { %2483 = vmatpush3.msra.mxu1 %v50_v23  ;;  %2428 = vmatprep.subr.mxu0 %v1991_v24  ;;  %v3227_v3 = vld [vmem:[%s4175_s0 + $0xa0] sm:$0xff]  ;;  %v2026_v7 = vld [vmem:[%s4179_s4 + $0x1b0] sm:$0xff] }
  0x1b   :  { %2484 = vmatprep.subr.mxu1 %v49_v25  ;;  %2429 = vmatpush3.msra.mxu0 %v1991_v24  ;;  %v72_v8 = vld [vmem:[%s4176_s1 + $0xb0] sm:$0xff]  ;;  %v73_v10 = vld [vmem:[%s4176_s1 + $0xc0] sm:$0xff] }
  0x1c   :  { %2485 = vmatpush3.msra.mxu1 %v49_v25  ;;  %2430 = vmatprep.subr.mxu0 %v1990_v26  ;;  %v3248_v9 = vld [vmem:[%s4175_s0 + $0xb0] sm:$0xff]  ;;  %v3256_v11 = vld [vmem:[%s4175_s0 + $0xc0] sm:$0xff] }
  0x1d   :  { %2486 = vmatprep.subr.mxu1 %v48_v27  ;;  %2431 = vmatpush3.msra.mxu0 %v1990_v26  ;;  %v2008_v14 = vld [vmem:[%s4179_s4 + $0x120] sm:$0xff]  ;;  %v74_v16 = vld [vmem:[%s4176_s1 + $0xd0] sm:$0xff] }
  0x1e   :  { %2487 = vmatpush3.msra.mxu1 %v48_v27  ;;  %2432 = vmatprep.subr.mxu0 %v1989_v28  ;;  %v2024_v15 = vld [vmem:[%s4179_s4 + $0x1a0] sm:$0xff]  ;;  %v3278_v17 = vld [vmem:[%s4175_s0 + $0xd0] sm:$0xff] }
  0x1f   :  { %2488 = vmatprep.subr.mxu1 %v47_v29  ;;  %2433 = vmatpush3.msra.mxu0 %v1989_v28  ;;  %v75_v18 = vld [vmem:[%s4176_s1 + $0xe0] sm:$0xff]  ;;  %v2006_v22 = vld [vmem:[%s4179_s4 + $0x110] sm:$0xff]  ;;  %v2005_v28 = vld [vmem:[%s4179_s4 + $0x108] sm:$0xff] }
  0x20   :  { %2489 = vmatpush3.msra.mxu1 %v47_v29  ;;  %2434 = vmatprep.subr.mxu0 %v1988_v30  ;;  %v3286_v19 = vld [vmem:[%s4175_s0 + $0xe0] sm:$0xff]  ;;  %v2022_v23 = vld [vmem:[%s4179_s4 + $0x190] sm:$0xff]  ;;  %v2021_v29 = vld [vmem:[%s4179_s4 + $0x188] sm:$0xff] }
  0x21   :  { %2490 = vmatprep.subr.mxu1 %v46_v31  ;;  %2435 = vmatpush3.msra.mxu0 %v1988_v30  ;;  %v3305_v24 = vld [vmem:[%s4176_s1 + $0xf0] sm:$0xff]  ;;  %v3315_v26 = vld [vmem:[%s4176_s1 + $0x100] sm:$0xff] }
  0x22   :  { %2436 = vmatprep.mubr.f32.mxu0 %v62_v32  ;;  %2491 = vmatpush3.msra.mxu1 %v46_v31  ;;  %v3310_v25 = vld [vmem:[%s4175_s0 + $0xf0] sm:$0xff]  ;;  %v3320_v27 = vld [vmem:[%s4175_s0 + $0x100] sm:$0xff] }
  0x23   :  { %2492 = vmatprep.mubr.f32.mxu1 %v30_v33  ;;  %2437 = vmatmul.mubr.f32.vlgmr.msra.gmra.mxu0 %v63_v34  ;;  %v2004_v30 = vld [vmem:[%s4179_s4 + $0x100] sm:$0xff]  ;;  %v3347_v34 = vld [vmem:[%s4175_s0 + $0x11] sm:$0xff] }
  0x24   :  { %2493 = vmatmul.mubr.f32.vlgmr.msra.gmra.mxu1 %v3110_v35  ;;  %2516 = vmatprep.subr.mxu0 %v2019_v36  ;;  %v2020_v31 = vld [vmem:[%s4179_s4 + $0x180] sm:$0xff] }
  0x25   :  { %2572 = vmatprep.subr.mxu1 %v2035_v37  ;;  %2517 = vmatpush3.msra.mxu0 %v2019_v36  ;;  %v385_v32 = vld [vmem:[%s4175_s0 + $0x1] sm:$0xff]  ;;  %v580_v36 = vld [vmem:[%s4177_s2 + $0x10] sm:$0xff] }
  0x26   :  { %2573 = vmatpush3.msra.mxu1 %v2035_v37  ;;  %2518 = vmatprep.subr.mxu0 %v2018_v38  ;;  %v579_v33 = vld [vmem:[%s4177_s2] sm:$0xff]  ;;  %v820_v37 = vld [vmem:[%s4180_s5 + $0xf8] sm:$0xff] }
  0x27   :  { %2574 = vmatprep.subr.mxu1 %v2034_v39  ;;  %2439 = vmatprep.mubr.f32.mxu0 %v64_v40  ;;  %v818_v40 = vld [vmem:[%s4180_s5 + $0xe8] sm:$0xff] }
  0x28   :  { %2495 = vmatprep.mubr.f32.mxu1 %v3131_v41  ;;  %2519 = vmatpush3.msra.mxu0 %v2018_v38  ;;  %v2051_v38 = vld [vmem:[%s4179_s4 + $0x2f8] sm:$0xff] }
  0x29   :  { %2575 = vmatpush3.msra.mxu1 %v2034_v39  ;;  %2440 = vmatmul.mubr.f32.gmra.mxu0 %v65_v42  ;;  %v819_v39 = vld [vmem:[%s4180_s5 + $0xf0] sm:$0xff] }
  0x2a   :  { %2496 = vmatmul.mubr.f32.gmra.mxu1 %v3139_v43  ;;  %2520 = vmatprep.subr.mxu0 %v2017_v44  ;;  %v2050_v42 = vld [vmem:[%s4179_s4 + $0x2f0] sm:$0xff] }
  0x2b   :  { %2576 = vmatprep.subr.mxu1 %v2033_v45  ;;  %2521 = vmatpush3.msra.mxu0 %v2017_v44  ;;  %v3371_v44 = vld [vmem:[%s4175_s0 + $0x21] sm:$0xff] }
  0x2c   :  { %2577 = vmatpush3.msra.mxu1 %v2033_v45  ;;  %2522 = vmatprep.subr.mxu0 %v2016_v46  ;;  %v581_v45 = vld [vmem:[%s4177_s2 + $0x20] sm:$0xff] }
  0x2d   :  { %2578 = vmatprep.subr.mxu1 %v2032_v47  ;;  %2442 = vmatprep.mubr.f32.mxu0 %v66_v48  ;;  %v582_v48 = vld [vmem:[%s4177_s2 + $0x30] sm:$0xff] }
  0x2e   :  { %2498 = vmatprep.mubr.f32.mxu1 %v3161_v49  ;;  %2523 = vmatpush3.msra.mxu0 %v2016_v46  ;;  %v817_v46 = vld [vmem:[%s4180_s5 + $0xe0] sm:$0xff] }
  0x2f   :  { %2579 = vmatpush3.msra.mxu1 %v2032_v47  ;;  %2443 = vmatmul.mubr.f32.gmra.mxu0 %v67_v50  ;;  %v3382_v47 = vld [vmem:[%s4175_s0 + $0x31] sm:$0xff] }
  0x30   :  { %2499 = vmatmul.mubr.f32.gmra.mxu1 %v3169_v51  ;;  %2524 = vmatprep.subr.mxu0 %v2015_v52  ;;  %v816_v50 = vld [vmem:[%s4180_s5 + $0xd8] sm:$0xff] }
  0x31   :  { %2580 = vmatprep.subr.mxu1 %v2031_v53  ;;  %2525 = vmatpush3.msra.mxu0 %v2015_v52  ;;  %v2049_v52 = vld [vmem:[%s4179_s4 + $0x2e8] sm:$0xff] }
  0x32   :  { %2581 = vmatpush3.msra.mxu1 %v2031_v53  ;;  %2526 = vmatprep.subr.mxu0 %v2014_v54  ;;  %v815_v53 = vld [vmem:[%s4180_s5 + $0xd0] sm:$0xff] }
  0x33   :  { %2582 = vmatprep.subr.mxu1 %v2030_v55  ;;  %2445 = vmatprep.mubr.f32.mxu0 %v68_v56 }
  0x34   :  { %2501 = vmatprep.mubr.f32.mxu1 %v3191_v57  ;;  %2527 = vmatpush3.msra.mxu0 %v2014_v54  ;;  %v814_v54 = vld [vmem:[%s4180_s5 + $0xc8] sm:$0xff] }
  0x35   :  { %2583 = vmatpush3.msra.mxu1 %v2030_v55  ;;  %2446 = vmatmul.mubr.f32.gmra.mxu0 %v69_v58  ;;  %v2048_v55 = vld [vmem:[%s4179_s4 + $0x2e0] sm:$0xff] }
  0x36   :  { %2502 = vmatmul.mubr.f32.gmra.mxu1 %v3199_v59  ;;  %2528 = vmatprep.subr.mxu0 %v2013_v60 }
  0x37   :  { %2584 = vmatprep.subr.mxu1 %v2029_v61  ;;  %2529 = vmatpush3.msra.mxu0 %v2013_v60 }
  0x38   :  { %2585 = vmatpush3.msra.mxu1 %v2029_v61  ;;  %2530 = vmatprep.subr.mxu0 %v2012_v62 }
  0x39   :  { %2586 = vmatprep.subr.mxu1 %v2028_v63  ;;  %2448 = vmatprep.mubr.f32.mxu0 %v70_v0 }
  0x3a   :  { %2504 = vmatprep.mubr.f32.mxu1 %v38_v1  ;;  %2531 = vmatpush3.msra.mxu0 %v2012_v62 }
  0x3b   :  { %2587 = vmatpush3.msra.mxu1 %v2028_v63  ;;  %2449 = vmatmul.mubr.f32.gmra.mxu0 %v71_v2 }
  0x3c   :  { %2505 = vmatmul.mubr.f32.gmra.mxu1 %v3227_v3  ;;  %2532 = vmatprep.subr.mxu0 %v2011_v4 }
  0x3d   :  { %2588 = vmatprep.subr.mxu1 %v2027_v5  ;;  %2533 = vmatpush3.msra.mxu0 %v2011_v4 }
  0x3e   :  { %2589 = vmatpush3.msra.mxu1 %v2027_v5  ;;  %2534 = vmatprep.subr.mxu0 %v2010_v6 }
  0x3f   :  { %2590 = vmatprep.subr.mxu1 %v2026_v7  ;;  %2451 = vmatprep.mubr.f32.mxu0 %v72_v8 }
  0x40   :  { %2507 = vmatprep.mubr.f32.mxu1 %v3248_v9  ;;  %2535 = vmatpush3.msra.mxu0 %v2010_v6 }
  0x41   :  { %2591 = vmatpush3.msra.mxu1 %v2026_v7  ;;  %2452 = vmatmul.mubr.f32.gmra.mxu0 %v73_v10 }
  0x42   :  { %2508 = vmatmul.mubr.f32.gmra.mxu1 %v3256_v11  ;;  %2536 = vmatprep.subr.mxu0 %v2009_v12 }
  0x43   :  { %2592 = vmatprep.subr.mxu1 %v2025_v13  ;;  %2537 = vmatpush3.msra.mxu0 %v2009_v12 }
  0x44   :  { %2593 = vmatpush3.msra.mxu1 %v2025_v13  ;;  %2538 = vmatprep.subr.mxu0 %v2008_v14 }
  0x45   :  { %2594 = vmatprep.subr.mxu1 %v2024_v15  ;;  %2454 = vmatprep.mubr.f32.mxu0 %v74_v16 }
  0x46   :  { %2510 = vmatprep.mubr.f32.mxu1 %v3278_v17  ;;  %2539 = vmatpush3.msra.mxu0 %v2008_v14 }
  0x47   :  { %2595 = vmatpush3.msra.mxu1 %v2024_v15  ;;  %2455 = vmatmul.mubr.f32.gmra.mxu0 %v75_v18 }
  0x48   :  { %2511 = vmatmul.mubr.f32.gmra.mxu1 %v3286_v19  ;;  %2540 = vmatprep.subr.mxu0 %v2007_v20 }
  0x49   :  { %2596 = vmatprep.subr.mxu1 %v2023_v21  ;;  %2541 = vmatpush3.msra.mxu0 %v2007_v20 }
  0x4a   :  { %2597 = vmatpush3.msra.mxu1 %v2023_v21  ;;  %2542 = vmatprep.subr.mxu0 %v2006_v22 }
  0x4b   :  { %2598 = vmatprep.subr.mxu1 %v2022_v23  ;;  %2457 = vmatprep.mubr.f32.mxu0 %v3305_v24 }
  0x4c   :  { %2513 = vmatprep.mubr.f32.mxu1 %v3310_v25  ;;  %2543 = vmatpush3.msra.mxu0 %v2006_v22 }
  0x4d   :  { %2599 = vmatpush3.msra.mxu1 %v2022_v23  ;;  %2458 = vmatmul.mubr.f32.gmra.mxu0 %v3315_v26 }
  0x4e   :  { %2514 = vmatmul.mubr.f32.gmra.mxu1 %v3320_v27  ;;  %2544 = vmatprep.subr.mxu0 %v2005_v28 }
  0x4f   :  { %2600 = vmatprep.subr.mxu1 %v2021_v29  ;;  %2545 = vmatpush3.msra.mxu0 %v2005_v28 }
  0x50   :  { %2601 = vmatpush3.msra.mxu1 %v2021_v29  ;;  %2546 = vmatprep.subr.mxu0 %v2004_v30 }
  0x51   :  { %2602 = vmatprep.subr.mxu1 %v2020_v31  ;;  %2547 = vmatpush3.msra.mxu0 %v2004_v30 }
  0x52   :  { %2548 = vmatprep.mubr.f32.mxu0 %v385_v32  ;;  %2603 = vmatpush3.msra.mxu1 %v2020_v31 }
  0x53   :  { %2604 = vmatprep.mubr.f32.mxu1 %v579_v33  ;;  %2549 = vmatmul.mubr.f32.vlgmr.msra.gmra.mxu0 %v3347_v34 }
  0x54   :  { %2605 = vmatmul.mubr.f32.vlgmr.msra.gmra.mxu1 %v580_v36  ;;  %821 = vmatprep.subr.mxu0 %v820_v37 }
  0x55   :  { %2628 = vmatprep.subr.mxu1 %v2051_v38  ;;  %822 = vmatpush1.msra.mxu0 %v819_v39 }
  0x56   :  { %2629 = vmatpush3.msra.mxu1 %v2051_v38  ;;  %823 = vmatprep.subr.mxu0 %v818_v40 }
  0x57   :  { %2630 = vmatprep.subr.mxu1 %v2050_v42  ;;  %2551 = vmatprep.mubr.f32.mxu0 %v3371_v44 }
  0x58   :  { %2607 = vmatprep.mubr.f32.mxu1 %v581_v45  ;;  %824 = vmatpush1.msra.mxu0 %v817_v46 }
  0x59   :  { %2631 = vmatpush3.msra.mxu1 %v2050_v42  ;;  %2552 = vmatmul.mubr.f32.gmra.mxu0 %v3382_v47 }
  0x5a   :  { %2608 = vmatmul.mubr.f32.gmra.mxu1 %v582_v48 }
  0x5b   :  { %17 = vsyncpa [#allocation8], 0  ;;  %825 = vmatprep.subr.mxu0 %v816_v50  ;;  %2632 = vmatprep.subr.mxu1 %v2049_v52  ;;  %v3407_v56 = vld [vmem:[%s4175_s0 + $0x41] sm:$0xff]  ;;  %v3418_v61 = vld [vmem:[%s4175_s0 + $0x51] sm:$0xff]  ;;  %vm1850_vm0 = vcmask 1040384  }
  0x5c   :  { %v583_v58 = vld [vmem:[%s4177_s2 + $0x40] sm:$0xff]  ;;  %826 = vmatpush1.msra.mxu0 %v815_v53  ;;  %2633 = vmatpush3.msra.mxu1 %v2049_v52  ;;  %v584_v62 = vld [vmem:[%s4177_s2 + $0x50] sm:$0xff]  ;;  %v812_v63 = vld [vmem:[%s4180_s5 + $0xb8] sm:$0xff] }
  0x5d   :  { %v813_v60 = vld [vmem:[%s4180_s5 + $0xc0] sm:$0xff]  ;;  %827 = vmatprep.subr.mxu0 %v814_v54  ;;  %2634 = vmatprep.subr.mxu1 %v2048_v55  ;;  %v2047_v0 = vld [vmem:[%s4179_s4 + $0x2d8] sm:$0xff]  ;;  %v811_v1 = vld [vmem:[%s4180_s5 + $0xb0] sm:$0xff] }
  0x5e   :  { %2554 = vmatprep.mubr.f32.mxu0 %v3407_v56  ;;  %2610 = vmatprep.mubr.f32.mxu1 %v583_v58  ;;  %v810_v2 = vld [vmem:[%s4180_s5 + $0xa8] sm:$0xff]  ;;  %v2046_v4 = vld [vmem:[%s4179_s4 + $0x2d0] sm:$0xff]  ;;  %v585_v6 = vld [vmem:[%s4177_s2 + $0x60] sm:$0xff] }
  0x5f   :  { %828 = vmatpush1.msra.mxu0 %v813_v60  ;;  %2635 = vmatpush3.msra.mxu1 %v2048_v55  ;;  %v3443_v5 = vld [vmem:[%s4175_s0 + $0x61] sm:$0xff]  ;;  %v3454_v8 = vld [vmem:[%s4175_s0 + $0x71] sm:$0xff] }
  0x60   :  { %2555 = vmatmul.mubr.f32.gmra.mxu0 %v3418_v61  ;;  %2611 = vmatmul.mubr.f32.gmra.mxu1 %v584_v62  ;;  %v809_v7 = vld [vmem:[%s4180_s5 + $0xa0] sm:$0xff]  ;;  %v586_v10 = vld [vmem:[%s4177_s2 + $0x70] sm:$0xff]  ;;  %v808_v12 = vld [vmem:[%s4180_s5 + $0x98] sm:$0xff] }
  0x61   :  { %829 = vmatprep.subr.mxu0 %v812_v63  ;;  %2636 = vmatprep.subr.mxu1 %v2047_v0  ;;  %v2045_v13 = vld [vmem:[%s4179_s4 + $0x2c8] sm:$0xff]  ;;  %v807_v14 = vld [vmem:[%s4180_s5 + $0x90] sm:$0xff]  ;;  %v2044_v16 = vld [vmem:[%s4179_s4 + $0x2c0] sm:$0xff] }
  0x62   :  { %830 = vmatpush1.msra.mxu0 %v811_v1  ;;  %2637 = vmatpush3.msra.mxu1 %v2047_v0  ;;  %v806_v15 = vld [vmem:[%s4180_s5 + $0x88] sm:$0xff]  ;;  %v393_v18 = vld [vmem:[%s4175_s0 + $0x91] sm:$0xff]  ;;  %v805_v21 = vld [vmem:[%s4180_s5 + $0x80] sm:$0xff] }
  0x63   :  { %831 = vmatprep.subr.mxu0 %v810_v2  ;;  %2638 = vmatprep.subr.mxu1 %v2046_v4  ;;  %v587_v20 = vld [vmem:[%s4177_s2 + $0x90] sm:$0xff]  ;;  %v3488_v22 = vld [vmem:[%s4175_s0 + $0xa1] sm:$0xff]  ;;  %v804_v28 = vld [vmem:[%s4180_s5 + $0x78] sm:$0xff] }
  0x64   :  { %2557 = vmatprep.mubr.f32.mxu0 %v3443_v5  ;;  %2613 = vmatprep.mubr.f32.mxu1 %v585_v6  ;;  %v588_v23 = vld [vmem:[%s4177_s2 + $0xa0] sm:$0xff]  ;;  %v2043_v29 = vld [vmem:[%s4179_s4 + $0x2b8] sm:$0xff]  ;;  %v803_v30 = vld [vmem:[%s4180_s5 + $0x70] sm:$0xff] }
  0x65   :  { %832 = vmatpush1.msra.mxu0 %v809_v7  ;;  %2639 = vmatpush3.msra.mxu1 %v2046_v4  ;;  %v802_v31 = vld [vmem:[%s4180_s5 + $0x68] sm:$0xff]  ;;  %v2042_v32 = vld [vmem:[%s4179_s4 + $0x2b0] sm:$0xff]  ;;  %v801_v37 = vld [vmem:[%s4180_s5 + $0x60] sm:$0xff] }
  0x66   :  { %2558 = vmatmul.mubr.f32.gmra.mxu0 %v3454_v8  ;;  %2614 = vmatmul.mubr.f32.gmra.mxu1 %v586_v10  ;;  %v3512_v33 = vld [vmem:[%s4175_s0 + $0xb1] sm:$0xff]  ;;  %v3523_v38 = vld [vmem:[%s4175_s0 + $0xc1] sm:$0xff] }
  0x67   :  { %833 = vmatprep.subr.mxu0 %v808_v12  ;;  %2640 = vmatprep.subr.mxu1 %v2045_v13  ;;  %v589_v36 = vld [vmem:[%s4177_s2 + $0xb0] sm:$0xff]  ;;  %v590_v39 = vld [vmem:[%s4177_s2 + $0xc0] sm:$0xff]  ;;  %v800_v40 = vld [vmem:[%s4180_s5 + $0x58] sm:$0xff] }
  0x68   :  { %834 = vmatpush1.msra.mxu0 %v807_v14  ;;  %2641 = vmatpush3.msra.mxu1 %v2045_v13  ;;  %v2041_v42 = vld [vmem:[%s4179_s4 + $0x2a8] sm:$0xff]  ;;  %v799_v45 = vld [vmem:[%s4180_s5 + $0x50] sm:$0xff]  ;;  %v2040_v48 = vld [vmem:[%s4179_s4 + $0x2a0] sm:$0xff] }
  0x69   :  { %835 = vmatprep.subr.mxu0 %v806_v15  ;;  %2642 = vmatprep.subr.mxu1 %v2044_v16  ;;  %v798_v46 = vld [vmem:[%s4180_s5 + $0x48] sm:$0xff]  ;;  %v3548_v50 = vld [vmem:[%s4175_s0 + $0xd1] sm:$0xff]  ;;  %v797_v53 = vld [vmem:[%s4180_s5 + $0x40] sm:$0xff] }
  0x6a   :  { %2560 = vmatprep.mubr.f32.mxu0 %v393_v18  ;;  %2616 = vmatprep.mubr.f32.mxu1 %v587_v20  ;;  %v591_v52 = vld [vmem:[%s4177_s2 + $0xd0] sm:$0xff]  ;;  %v3559_v54 = vld [vmem:[%s4175_s0 + $0xe1] sm:$0xff]  ;;  %v796_v58 = vld [vmem:[%s4180_s5 + $0x38] sm:$0xff] }
  0x6b   :  { %836 = vmatpush1.msra.mxu0 %v805_v21  ;;  %2643 = vmatpush3.msra.mxu1 %v2044_v16  ;;  %v592_v55 = vld [vmem:[%s4177_s2 + $0xe0] sm:$0xff]  ;;  %v2039_v60 = vld [vmem:[%s4179_s4 + $0x298] sm:$0xff]  ;;  %v795_v62 = vld [vmem:[%s4180_s5 + $0x30] sm:$0xff] }
  0x6c   :  { %2561 = vmatmul.mubr.f32.gmra.mxu0 %v3488_v22  ;;  %2617 = vmatmul.mubr.f32.gmra.mxu1 %v588_v23  ;;  %v794_v63 = vld [vmem:[%s4180_s5 + $0x28] sm:$0xff]  ;;  %v2038_v0 = vld [vmem:[%s4179_s4 + $0x290] sm:$0xff]  ;;  %v793_v4 = vld [vmem:[%s4180_s5 + $0x20] sm:$0xff]  ;;  %v2945_v23 = vmov 0.0  }
  0x6d   :  { %837 = vmatprep.subr.mxu0 %v804_v28  ;;  %2644 = vmatprep.subr.mxu1 %v2043_v29  ;;  %v3584_v1 = vld [vmem:[%s4175_s0 + $0xf1] sm:$0xff]  ;;  %v3595_v6 = vld [vmem:[%s4175_s0 + $0x101] sm:$0xff] }
  0x6e   :  { %838 = vmatpush1.msra.mxu0 %v803_v30  ;;  %2645 = vmatpush3.msra.mxu1 %v2043_v29  ;;  %v593_v2 = vld [vmem:[%s4177_s2 + $0xf0] sm:$0xff]  ;;  %v594_v7 = vld [vmem:[%s4177_s2 + $0x100] sm:$0xff]  ;;  %v792_v10 = vld [vmem:[%s4180_s5 + $0x18] sm:$0xff] }
  0x6f   :  { %839 = vmatprep.subr.mxu0 %v802_v31  ;;  %2646 = vmatprep.subr.mxu1 %v2042_v32  ;;  %v2037_v12 = vld [vmem:[%s4179_s4 + $0x288] sm:$0xff]  ;;  %v791_v13 = vld [vmem:[%s4180_s5 + $0x10] sm:$0xff]  ;;  %v2036_v15 = vld [vmem:[%s4179_s4 + $0x280] sm:$0xff] }
  0x70   :  { %2563 = vmatprep.mubr.f32.mxu0 %v3512_v33  ;;  %2619 = vmatprep.mubr.f32.mxu1 %v589_v36  ;;  %v790_v14 = vld [vmem:[%s4180_s5 + $0x8] sm:$0xff]  ;;  %v789_v16 = vld [vmem:[%s4180_s5] sm:$0xff]  ;;  %v999_v21 = vld [vmem:[%s4177_s2 + $0x11] sm:$0xff] }
  0x71   :  { %840 = vmatpush1.msra.mxu0 %v801_v37  ;;  %2647 = vmatpush3.msra.mxu1 %v2042_v32  ;;  %v998_v18 = vld [vmem:[%s4177_s2 + $0x1] sm:$0xff]  ;;  %v2083_v28 = vld [vmem:[%s4179_s4 + $0x378] sm:$0xff]  ;;  %v2082_v30 = vld [vmem:[%s4179_s4 + $0x370] sm:$0xff] }
  0x72   :  { %2564 = vmatmul.mubr.f32.gmra.mxu0 %v3523_v38  ;;  %2620 = vmatmul.mubr.f32.gmra.mxu1 %v590_v39  ;;  %v773_v20 = vld [vmem:[%s4178_s3] sm:$0xff]  ;;  %v2115_v29 = vld [vmem:[%s4179_s4 + $0x3f8] sm:$0xff]  ;;  %v774_v32 = vld [vmem:[%s4178_s3 + $0x10] sm:$0xff] }
  0x73   :  { %841 = vmatprep.subr.mxu0 %v800_v40  ;;  %2648 = vmatprep.subr.mxu1 %v2041_v42  ;;  %v1000_v31 = vld [vmem:[%s4177_s2 + $0x21] sm:$0xff]  ;;  %v1001_v36 = vld [vmem:[%s4177_s2 + $0x31] sm:$0xff] }
  0x74   :  { %842 = vmatpush1.msra.mxu0 %v799_v45  ;;  %2649 = vmatpush3.msra.mxu1 %v2041_v42  ;;  %v2081_v37 = vld [vmem:[%s4179_s4 + $0x368] sm:$0xff]  ;;  %v2114_v39 = vld [vmem:[%s4179_s4 + $0x3f0] sm:$0xff]  ;;  %v2080_v40 = vld [vmem:[%s4179_s4 + $0x360] sm:$0xff] }
  0x75   :  { %843 = vmatprep.subr.mxu0 %v798_v46  ;;  %2650 = vmatprep.subr.mxu1 %v2040_v48  ;;  %v1002_v42 = vld [vmem:[%s4177_s2 + $0x41] sm:$0xff]  ;;  %v1003_v46 = vld [vmem:[%s4177_s2 + $0x51] sm:$0xff] }
  0x76   :  { %2566 = vmatprep.mubr.f32.mxu0 %v3548_v50  ;;  %2622 = vmatprep.mubr.f32.mxu1 %v591_v52  ;;  %v775_v45 = vld [vmem:[%s4178_s3 + $0x20] sm:$0xff]  ;;  %v2113_v52 = vld [vmem:[%s4179_s4 + $0x3e8] sm:$0xff] }
  0x77   :  { %844 = vmatpush1.msra.mxu0 %v797_v53  ;;  %2651 = vmatpush3.msra.mxu1 %v2040_v48  ;;  %v2079_v48 = vld [vmem:[%s4179_s4 + $0x358] sm:$0xff]  ;;  %v2078_v53 = vld [vmem:[%s4179_s4 + $0x350] sm:$0xff] }
  0x78   :  { %2567 = vmatmul.mubr.f32.gmra.mxu0 %v3559_v54  ;;  %2623 = vmatmul.mubr.f32.gmra.mxu1 %v592_v55  ;;  %v1004_v55 = vld [vmem:[%s4177_s2 + $0x61] sm:$0xff] }
  0x79   :  { %845 = vmatprep.subr.mxu0 %v796_v58  ;;  %2652 = vmatprep.subr.mxu1 %v2039_v60  ;;  %v776_v58 = vld [vmem:[%s4178_s3 + $0x30] sm:$0xff] }
  0x7a   :  { %846 = vmatpush1.msra.mxu0 %v795_v62  ;;  %2653 = vmatpush3.msra.mxu1 %v2039_v60  ;;  %v1005_v60 = vld [vmem:[%s4177_s2 + $0x71] sm:$0xff]  ;;  %v2077_v62 = vld [vmem:[%s4179_s4 + $0x348] sm:$0xff] }
  0x7b   :  { %847 = vmatprep.subr.mxu0 %v794_v63  ;;  %2654 = vmatprep.subr.mxu1 %v2038_v0  ;;  %v2112_v63 = vld [vmem:[%s4179_s4 + $0x3e0] sm:$0xff] }
  0x7c   :  { %2569 = vmatprep.mubr.f32.mxu0 %v3584_v1  ;;  %2625 = vmatprep.mubr.f32.mxu1 %v593_v2  ;;  %v1006_v2 = vld [vmem:[%s4177_s2 + $0x91] sm:$0xff] }
  0x7d   :  { %848 = vmatpush1.msra.mxu0 %v793_v4  ;;  %2655 = vmatpush3.msra.mxu1 %v2038_v0  ;;  %v2076_v0 = vld [vmem:[%s4179_s4 + $0x340] sm:$0xff] }
  0x7e   :  { %2570 = vmatmul.mubr.f32.gmra.mxu0 %v3595_v6  ;;  %2626 = vmatmul.mubr.f32.gmra.mxu1 %v594_v7  ;;  %v777_v4 = vld [vmem:[%s4178_s3 + $0x40] sm:$0xff] }
  0x7f   :  { %849 = vmatprep.subr.mxu0 %v792_v10  ;;  %2656 = vmatprep.subr.mxu1 %v2037_v12  ;;  %v1007_v7 = vld [vmem:[%s4177_s2 + $0xa1] sm:$0xff]  ;;  %v2075_v10 = vld [vmem:[%s4179_s4 + $0x338] sm:$0xff] }
  0x80   :  { %850 = vmatpush1.msra.mxu0 %v791_v13  ;;  %2657 = vmatpush3.msra.mxu1 %v2037_v12  ;;  %v2111_v12 = vld [vmem:[%s4179_s4 + $0x3d8] sm:$0xff]  ;;  %v2074_v13 = vld [vmem:[%s4179_s4 + $0x330] sm:$0xff] }
  0x81   :  { %851 = vmatprep.subr.mxu0 %v790_v14  ;;  %2658 = vmatprep.subr.mxu1 %v2036_v15  ;;  %v1008_v14 = vld [vmem:[%s4177_s2 + $0xb1] sm:$0xff] }
  0x82   :  { %852 = vmatpush1.msra.mxu0 %v789_v16  ;;  %885 = vmatprep.mubr.f32.mxu0 %v2945_v23  ;;  %v1009_v16 = vld [vmem:[%s4177_s2 + $0xc1] sm:$0xff] }
  0x83   :  { %2659 = vmatpush3.msra.mxu1 %v2036_v15  ;;  %2660 = vmatprep.mubr.f32.mxu1 %v998_v18  ;;  %v778_v15 = vld [vmem:[%s4178_s3 + $0x50] sm:$0xff]  ;;  %v2073_v18 = vld [vmem:[%s4179_s4 + $0x328] sm:$0xff] }
  0x84   :  { %886 = vmatmul.mubr.f32.vlgmr.msra.gmra.mxu0 %v773_v20  ;;  %2661 = vmatmul.mubr.f32.vlgmr.msra.gmra.mxu1 %v999_v21  ;;  %v2110_v20 = vld [vmem:[%s4179_s4 + $0x3d0] sm:$0xff]  ;;  %v2072_v21 = vld [vmem:[%s4179_s4 + $0x320] sm:$0xff] }
  0x85   :  { %2684 = vmatprep.subr.mxu1 %v2083_v28  ;;  %2740 = vmatprep.subr.mxu0 %v2115_v29 }
  0x86   :  { %2685 = vmatpush3.msra.mxu1 %v2083_v28  ;;  %2741 = vmatpush3.msra.mxu0 %v2115_v29  ;;  %v1010_v28 = vld [vmem:[%s4177_s2 + $0xd1] sm:$0xff]  ;;  %v779_v29 = vld [vmem:[%s4178_s3 + $0x60] sm:$0xff] }
  0x87   :  { %2686 = vmatprep.subr.mxu1 %v2082_v30  ;;  %891 = vmatprep.mubr.f32.mxu0 %v2945_v23 }
  0x88   :  { %2663 = vmatprep.mubr.f32.mxu1 %v1000_v31  ;;  %2687 = vmatpush3.msra.mxu1 %v2082_v30  ;;  %v1011_v30 = vld [vmem:[%s4177_s2 + $0xe1] sm:$0xff]  ;;  %v2071_v31 = vld [vmem:[%s4179_s4 + $0x318] sm:$0xff] }
  0x89   :  { %892 = vmatmul.mubr.f32.gmra.mxu0 %v774_v32  ;;  %2664 = vmatmul.mubr.f32.gmra.mxu1 %v1001_v36  ;;  %v2109_v32 = vld [vmem:[%s4179_s4 + $0x3c8] sm:$0xff]  ;;  %v2070_v36 = vld [vmem:[%s4179_s4 + $0x310] sm:$0xff] }
  0x8a   :  { %2688 = vmatprep.subr.mxu1 %v2081_v37  ;;  %2742 = vmatprep.subr.mxu0 %v2114_v39 }
  0x8b   :  { %2689 = vmatpush3.msra.mxu1 %v2081_v37  ;;  %2743 = vmatpush3.msra.mxu0 %v2114_v39  ;;  %v1012_v37 = vld [vmem:[%s4177_s2 + $0xf1] sm:$0xff] }
  0x8c   :  { %2690 = vmatprep.subr.mxu1 %v2080_v40  ;;  %897 = vmatprep.mubr.f32.mxu0 %v2945_v23  ;;  %v780_v39 = vld [vmem:[%s4178_s3 + $0x70] sm:$0xff] }
  0x8d   :  { %2666 = vmatprep.mubr.f32.mxu1 %v1002_v42  ;;  %2691 = vmatpush3.msra.mxu1 %v2080_v40  ;;  %v1013_v40 = vld [vmem:[%s4177_s2 + $0x101] sm:$0xff] }
  0x8e   :  { %898 = vmatmul.mubr.f32.gmra.mxu0 %v775_v45  ;;  %2667 = vmatmul.mubr.f32.gmra.mxu1 %v1003_v46  ;;  %v2069_v42 = vld [vmem:[%s4179_s4 + $0x308] sm:$0xff]  ;;  %v2108_v45 = vld [vmem:[%s4179_s4 + $0x3c0] sm:$0xff] }
  0x8f   :  { %2692 = vmatprep.subr.mxu1 %v2079_v48  ;;  %2744 = vmatprep.subr.mxu0 %v2113_v52  ;;  %v2068_v46 = vld [vmem:[%s4179_s4 + $0x300] sm:$0xff] }
  0x90   :  { %2693 = vmatpush3.msra.mxu1 %v2079_v48  ;;  %2745 = vmatpush3.msra.mxu0 %v2113_v52  ;;  %v781_v48 = vld [vmem:[%s4178_s3 + $0x90] sm:$0xff]  ;;  %v2107_v52 = vld [vmem:[%s4179_s4 + $0x3b8] sm:$0xff] }
  0x91   :  { %2694 = vmatprep.subr.mxu1 %v2078_v53  ;;  %903 = vmatprep.mubr.f32.mxu0 %v2945_v23 }
  0x92   :  { %2669 = vmatprep.mubr.f32.mxu1 %v1004_v55  ;;  %2695 = vmatpush3.msra.mxu1 %v2078_v53  ;;  %v2147_v53 = vld [vmem:[%s4179_s4 + $0x478] sm:$0xff]  ;;  %v2146_v55 = vld [vmem:[%s4179_s4 + $0x470] sm:$0xff] }
  0x93   :  { %904 = vmatmul.mubr.f32.gmra.mxu0 %v776_v58  ;;  %2670 = vmatmul.mubr.f32.gmra.mxu1 %v1005_v60  ;;  %v782_v58 = vld [vmem:[%s4178_s3 + $0xa0] sm:$0xff]  ;;  %v2106_v60 = vld [vmem:[%s4179_s4 + $0x3b0] sm:$0xff] }
  0x94   :  { %2696 = vmatprep.subr.mxu1 %v2077_v62  ;;  %2746 = vmatprep.subr.mxu0 %v2112_v63 }
  0x95   :  { %2697 = vmatpush3.msra.mxu1 %v2077_v62  ;;  %2747 = vmatpush3.msra.mxu0 %v2112_v63  ;;  %v783_v62 = vld [vmem:[%s4178_s3 + $0xb0] sm:$0xff] }
  0x96   :  { %2698 = vmatprep.subr.mxu1 %v2076_v0  ;;  %909 = vmatprep.mubr.f32.mxu0 %v2945_v23  ;;  %v2142_v63 = vld [vmem:[%s4179_s4 + $0x450] sm:$0xff] }
  0x97   :  { %2672 = vmatprep.mubr.f32.mxu1 %v1006_v2  ;;  %2699 = vmatpush3.msra.mxu1 %v2076_v0  ;;  %v784_v0 = vld [vmem:[%s4178_s3 + $0xc0] sm:$0xff]  ;;  %v2141_v2 = vld [vmem:[%s4179_s4 + $0x448] sm:$0xff] }
  0x98   :  { %910 = vmatmul.mubr.f32.gmra.mxu0 %v777_v4  ;;  %2673 = vmatmul.mubr.f32.gmra.mxu1 %v1007_v7  ;;  %v2140_v4 = vld [vmem:[%s4179_s4 + $0x440] sm:$0xff]  ;;  %v785_v7 = vld [vmem:[%s4178_s3 + $0xd0] sm:$0xff] }
  0x99   :  { %2700 = vmatprep.subr.mxu1 %v2075_v10  ;;  %2748 = vmatprep.subr.mxu0 %v2111_v12 }
  0x9a   :  { %2701 = vmatpush3.msra.mxu1 %v2075_v10  ;;  %2749 = vmatpush3.msra.mxu0 %v2111_v12  ;;  %v2139_v10 = vld [vmem:[%s4179_s4 + $0x438] sm:$0xff]  ;;  %v2138_v12 = vld [vmem:[%s4179_s4 + $0x430] sm:$0xff] }
  0x9b   :  { %2702 = vmatprep.subr.mxu1 %v2074_v13  ;;  %915 = vmatprep.mubr.f32.mxu0 %v2945_v23 }
  0x9c   :  { %2675 = vmatprep.mubr.f32.mxu1 %v1008_v14  ;;  %2703 = vmatpush3.msra.mxu1 %v2074_v13  ;;  %v786_v13 = vld [vmem:[%s4178_s3 + $0xe0] sm:$0xff] }
  0x9d   :  { %916 = vmatmul.mubr.f32.gmra.mxu0 %v778_v15  ;;  %2676 = vmatmul.mubr.f32.gmra.mxu1 %v1009_v16  ;;  %v2136_v14 = vld [vmem:[%s4179_s4 + $0x420] sm:$0xff]  ;;  %v787_v15 = vld [vmem:[%s4178_s3 + $0xf0] sm:$0xff] }
  0x9e   :  { %2704 = vmatprep.subr.mxu1 %v2073_v18  ;;  %2750 = vmatprep.subr.mxu0 %v2110_v20  ;;  %v2134_v16 = vld [vmem:[%s4179_s4 + $0x410] sm:$0xff] }
  0x9f   :  { %2705 = vmatpush3.msra.mxu1 %v2073_v18  ;;  %2751 = vmatpush3.msra.mxu0 %v2110_v20  ;;  %v788_v18 = vld [vmem:[%s4178_s3 + $0x100] sm:$0xff]  ;;  %v2133_v20 = vld [vmem:[%s4179_s4 + $0x408] sm:$0xff] }
  0xa0   :  { %2706 = vmatprep.subr.mxu1 %v2072_v21  ;;  %921 = vmatprep.mubr.f32.mxu0 %v2945_v23 }
  0xa1   :  { %2678 = vmatprep.mubr.f32.mxu1 %v1010_v28  ;;  %2707 = vmatpush3.msra.mxu1 %v2072_v21  ;;  %v2085_v21 = vld [vmem:[%s4176_s1 + $0x20] sm:$0xff]  ;;  %v2086_v28 = vld [vmem:[%s4176_s1 + $0x30] sm:$0xff] }
  0xa2   :  { %922 = vmatmul.mubr.f32.gmra.mxu0 %v779_v29  ;;  %2679 = vmatmul.mubr.f32.gmra.mxu1 %v1011_v30  ;;  %v2087_v29 = vld [vmem:[%s4176_s1 + $0x40] sm:$0xff]  ;;  %v2088_v30 = vld [vmem:[%s4176_s1 + $0x50] sm:$0xff] }
  0xa3   :  { %2708 = vmatprep.subr.mxu1 %v2071_v31  ;;  %2752 = vmatprep.subr.mxu0 %v2109_v32 }
  0xa4   :  { %2709 = vmatpush3.msra.mxu1 %v2071_v31  ;;  %2753 = vmatpush3.msra.mxu0 %v2109_v32  ;;  %v2090_v31 = vld [vmem:[%s4176_s1 + $0x70] sm:$0xff]  ;;  %v2094_v32 = vld [vmem:[%s4176_s1 + $0xc0] sm:$0xff] }
  0xa5   :  { %2710 = vmatprep.subr.mxu1 %v2070_v36  ;;  %927 = vmatprep.mubr.f32.mxu0 %v2945_v23 }
  0xa6   :  { %2681 = vmatprep.mubr.f32.mxu1 %v1012_v37  ;;  %2711 = vmatpush3.msra.mxu1 %v2070_v36 }
  0xa7   :  { %928 = vmatmul.mubr.f32.gmra.mxu0 %v780_v39  ;;  %2682 = vmatmul.mubr.f32.gmra.mxu1 %v1013_v40 }
  0xa8   :  { %2712 = vmatprep.subr.mxu1 %v2069_v42  ;;  %2754 = vmatprep.subr.mxu0 %v2108_v45 }
  0xa9   :  { %2713 = vmatpush3.msra.mxu1 %v2069_v42  ;;  %2755 = vmatpush3.msra.mxu0 %v2108_v45 }
  0xaa   :  { %2714 = vmatprep.subr.mxu1 %v2068_v46  ;;  %933 = vmatprep.mubr.f32.mxu0 %v2945_v23 }
  0xab   :  { %2715 = vmatpush3.msra.mxu1 %v2068_v46  ;;  %2716 = vmatprep.mubr.f32.mxu1 %v3110_v35  ;;  %v2145_v35 = vld [vmem:[%s4179_s4 + $0x468] sm:$0xff] }
  0xac   :  { %934 = vmatmul.mubr.f32.gmra.mxu0 %v781_v48  ;;  %2717 = vmatmul.mubr.f32.vlgmr.msra.gmra.mxu1 %v3131_v41  ;;  %v2144_v41 = vld [vmem:[%s4179_s4 + $0x460] sm:$0xff] }
  0xad   :  { %2756 = vmatprep.subr.mxu0 %v2107_v52  ;;  %2796 = vmatprep.subr.mxu1 %v2147_v53 }
  0xae   :  { %2757 = vmatpush3.msra.mxu0 %v2107_v52  ;;  %2797 = vmatpush3.msra.mxu1 %v2147_v53 }
  0xaf   :  { %939 = vmatprep.mubr.f32.mxu0 %v2945_v23  ;;  %2719 = vmatprep.mubr.f32.mxu1 %v3139_v43  ;;  %v2105_v43 = vld [vmem:[%s4179_s4 + $0x3a8] sm:$0xff] }
  0xb0   :  { %2798 = vmatprep.subr.mxu1 %v2146_v55  ;;  %940 = vmatmul.mubr.f32.gmra.mxu0 %v782_v58 }
  0xb1   :  { %2720 = vmatmul.mubr.f32.gmra.mxu1 %v3161_v49  ;;  %2758 = vmatprep.subr.mxu0 %v2106_v60  ;;  %v2143_v49 = vld [vmem:[%s4179_s4 + $0x458] sm:$0xff] }
  0xb2   :  { %2799 = vmatpush3.msra.mxu1 %v2146_v55  ;;  %2759 = vmatpush3.msra.mxu0 %v2106_v60 }
  0xb3   :  { %2800 = vmatprep.subr.mxu1 %v2145_v35  ;;  %945 = vmatprep.mubr.f32.mxu0 %v2945_v23 }
  0xb4   :  { %2801 = vmatpush3.msra.mxu1 %v2145_v35  ;;  %2722 = vmatprep.mubr.f32.mxu1 %v3169_v51  ;;  %v2059_v51 = vld [vmem:[%s4175_s0 + $0x80] sm:$0xff] }
  0xb5   :  { %2802 = vmatprep.subr.mxu1 %v2144_v41  ;;  %946 = vmatmul.mubr.f32.gmra.mxu0 %v783_v62 }
  0xb6   :  { %2723 = vmatmul.mubr.f32.gmra.mxu1 %v3191_v57  ;;  %2760 = vmatprep.subr.mxu0 %v2105_v43  ;;  %v2104_v57 = vld [vmem:[%s4179_s4 + $0x3a0] sm:$0xff] }
  0xb7   :  { %2803 = vmatpush3.msra.mxu1 %v2144_v41  ;;  %2761 = vmatpush3.msra.mxu0 %v2105_v43 }
  0xb8   :  { %2804 = vmatprep.subr.mxu1 %v2143_v49  ;;  %951 = vmatprep.mubr.f32.mxu0 %v2945_v23 }
  0xb9   :  { %2805 = vmatpush3.msra.mxu1 %v2143_v49  ;;  %2725 = vmatprep.mubr.f32.mxu1 %v3199_v59  ;;  %v2103_v59 = vld [vmem:[%s4179_s4 + $0x398] sm:$0xff] }
  0xba   :  { %2806 = vmatprep.subr.mxu1 %v2142_v63  ;;  %952 = vmatmul.mubr.f32.gmra.mxu0 %v784_v0 }
  0xbb   :  { %2726 = vmatmul.mubr.f32.gmra.mxu1 %v2059_v51  ;;  %2762 = vmatprep.subr.mxu0 %v2104_v57 }
  0xbc   :  { %2807 = vmatpush3.msra.mxu1 %v2142_v63  ;;  %2763 = vmatpush3.msra.mxu0 %v2104_v57 }
  0xbd   :  { %2808 = vmatprep.subr.mxu1 %v2141_v2  ;;  %957 = vmatprep.mubr.f32.mxu0 %v2945_v23 }
  0xbe   :  { %2809 = vmatpush3.msra.mxu1 %v2141_v2  ;;  %2728 = vmatprep.mubr.f32.mxu1 %v3227_v3  ;;  %v2102_v3 = vld [vmem:[%s4179_s4 + $0x390] sm:$0xff] }
  0xbf   :  { %2810 = vmatprep.subr.mxu1 %v2140_v4  ;;  %958 = vmatmul.mubr.f32.gmra.mxu0 %v785_v7 }
  0xc0   :  { %2729 = vmatmul.mubr.f32.gmra.mxu1 %v3248_v9  ;;  %2764 = vmatprep.subr.mxu0 %v2103_v59  ;;  %v2137_v9 = vld [vmem:[%s4179_s4 + $0x428] sm:$0xff] }
  0xc1   :  { %2811 = vmatpush3.msra.mxu1 %v2140_v4  ;;  %2765 = vmatpush3.msra.mxu0 %v2103_v59 }
  0xc2   :  { %2812 = vmatprep.subr.mxu1 %v2139_v10  ;;  %963 = vmatprep.mubr.f32.mxu0 %v2945_v23 }
  0xc3   :  { %2813 = vmatpush3.msra.mxu1 %v2139_v10  ;;  %2731 = vmatprep.mubr.f32.mxu1 %v3256_v11  ;;  %v2101_v11 = vld [vmem:[%s4179_s4 + $0x388] sm:$0xff] }
  0xc4   :  { %2814 = vmatprep.subr.mxu1 %v2138_v12  ;;  %964 = vmatmul.mubr.f32.gmra.mxu0 %v786_v13 }
  0xc5   :  { %2732 = vmatmul.mubr.f32.gmra.mxu1 %v3278_v17  ;;  %2766 = vmatprep.subr.mxu0 %v2102_v3  ;;  %v2135_v17 = vld [vmem:[%s4179_s4 + $0x418] sm:$0xff] }
  0xc6   :  { %2815 = vmatpush3.msra.mxu1 %v2138_v12  ;;  %2767 = vmatpush3.msra.mxu0 %v2102_v3 }
  0xc7   :  { %2816 = vmatprep.subr.mxu1 %v2137_v9  ;;  %969 = vmatprep.mubr.f32.mxu0 %v2945_v23 }
  0xc8   :  { %2817 = vmatpush3.msra.mxu1 %v2137_v9  ;;  %2734 = vmatprep.mubr.f32.mxu1 %v3286_v19  ;;  %v2067_v19 = vld [vmem:[%s4175_s0 + $0x110] sm:$0xff] }
  0xc9   :  { %2818 = vmatprep.subr.mxu1 %v2136_v14  ;;  %970 = vmatmul.mubr.f32.gmra.mxu0 %v787_v15 }
  0xca   :  { %2735 = vmatmul.mubr.f32.gmra.mxu1 %v3310_v25  ;;  %2768 = vmatprep.subr.mxu0 %v2101_v11  ;;  %v2100_v25 = vld [vmem:[%s4179_s4 + $0x380] sm:$0xff] }
  0xcb   :  { %2819 = vmatpush3.msra.mxu1 %v2136_v14  ;;  %2769 = vmatpush3.msra.mxu0 %v2101_v11 }
  0xcc   :  { %2820 = vmatprep.subr.mxu1 %v2135_v17  ;;  %975 = vmatprep.mubr.f32.mxu0 %v2945_v23  ;;  %v2084_v23 = vld [vmem:[%s4176_s1 + $0x10] sm:$0xff] }
  0xcd   :  { %2821 = vmatpush3.msra.mxu1 %v2135_v17  ;;  %2737 = vmatprep.mubr.f32.mxu1 %v3320_v27  ;;  %v2132_v27 = vld [vmem:[%s4179_s4 + $0x400] sm:$0xff] }
  0xce   :  { %2822 = vmatprep.subr.mxu1 %v2134_v16  ;;  %976 = vmatmul.mubr.f32.gmra.mxu0 %v788_v18 }
  0xcf   :  { %2738 = vmatmul.mubr.f32.gmra.mxu1 %v2067_v19  ;;  %2770 = vmatprep.subr.mxu0 %v2100_v25 }
  0xd0   :  { %2823 = vmatpush3.msra.mxu1 %v2134_v16  ;;  %2771 = vmatpush3.msra.mxu0 %v2100_v25 }
  0xd1   :  { %2824 = vmatprep.subr.mxu1 %v2133_v20  ;;  %2772 = vmatprep.mubr.f32.mxu0 %v2084_v23 }
  0xd2   :  { %2825 = vmatpush3.msra.mxu1 %v2133_v20  ;;  %2773 = vmatmul.mubr.f32.vlgmr.msra.gmra.mxu0 %v2085_v21 }
  0xd3   :  { %2826 = vmatprep.subr.mxu1 %v2132_v27  ;;  %2828 = vmatprep.mubr.f32.mxu1 %v3347_v34  ;;  %v2089_v34 = vld [vmem:[%s4176_s1 + $0x60] sm:$0xff] }
  0xd4   :  { %2827 = vmatpush3.msra.mxu1 %v2132_v27  ;;  %2775 = vmatprep.mubr.f32.mxu0 %v2086_v28 }
  0xd5   :  { %2829 = vmatmul.mubr.f32.vlgmr.msra.gmra.mxu1 %v3371_v44  ;;  %v2091_v44 = vld [vmem:[%s4176_s1 + $0x80] sm:$0xff] }
  0xd6   :  { %2776 = vmatmul.mubr.f32.gmra.mxu0 %v2087_v29  ;;  %2831 = vmatprep.mubr.f32.mxu1 %v3382_v47  ;;  %v2092_v47 = vld [vmem:[%s4176_s1 + $0xa0] sm:$0xff] }
  0xd7   :  { %2778 = vmatprep.mubr.f32.mxu0 %v2088_v30 }
  0xd9   :  { %2832 = vmatmul.mubr.f32.gmra.mxu1 %v3407_v56  ;;  %v2123_v56 = vld [vmem:[%s4175_s0 + $0x81] sm:$0xff] }
  0xda   :  { %2779 = vmatmul.mubr.f32.gmra.mxu0 %v2089_v34  ;;  %2834 = vmatprep.mubr.f32.mxu1 %v3418_v61  ;;  %v2093_v61 = vld [vmem:[%s4176_s1 + $0xb0] sm:$0xff] }
  0xdb   :  { %2781 = vmatprep.mubr.f32.mxu0 %v2090_v31 }
  0xdd   :  { %2835 = vmatmul.mubr.f32.gmra.mxu1 %v3443_v5  ;;  %v2095_v5 = vld [vmem:[%s4176_s1 + $0xd0] sm:$0xff] }
  0xde   :  { %2782 = vmatmul.mubr.f32.gmra.mxu0 %v2091_v44  ;;  %2837 = vmatprep.mubr.f32.mxu1 %v3454_v8  ;;  %v2096_v8 = vld [vmem:[%s4176_s1 + $0xe0] sm:$0xff] }
  0xdf   :  { %2784 = vmatprep.mubr.f32.mxu0 %v2092_v47 }
  0xe1   :  { %2838 = vmatmul.mubr.f32.gmra.mxu1 %v2123_v56 }
  0xe2   :  { %2785 = vmatmul.mubr.f32.gmra.mxu0 %v2093_v61  ;;  %2840 = vmatprep.mubr.f32.mxu1 %v3488_v22 }
  0xe3   :  { %2787 = vmatprep.mubr.f32.mxu0 %v2094_v32  ;;  %v2438_v36 = vpop.f32.mrf.mxu0 }
  0xe4   :  { %v2494_v37 = vpop.f32.mrf.mxu1 }
  0xe5   :  { %2841 = vmatmul.mubr.f32.gmra.mxu1 %v3512_v33  ;;  %v312_v39 = vadd.f32 %v2494_v37, %v2438_v36  ;;  %v161_v40 = vpop.f32.mrf.mxu0  ;;  %v2099_v33 = vld [vmem:[%s4176_s1 + $0x110] sm:$0xff] }
  0xe6   :  { %2788 = vmatmul.mubr.f32.gmra.mxu0 %v2095_v5  ;;  %2843 = vmatprep.mubr.f32.mxu1 %v3523_v38  ;;  %v306_v42 = vpop.f32.mrf.mxu1 }
  0xe7   :  { %2790 = vmatprep.mubr.f32.mxu0 %v2096_v8  ;;  %v307_v22 = vadd.f32 %v306_v42, %v161_v40 }
  0xe9   :  { %2844 = vmatmul.mubr.f32.gmra.mxu1 %v3548_v50  ;;  %v2441_v45 = vpop.f32.mrf.mxu0 }
  0xea   :  { %2791 = vmatmul.mubr.f32.gmra.mxu0 %v3305_v24  ;;  %2846 = vmatprep.mubr.f32.mxu1 %v3559_v54  ;;  %v2497_v46 = vpop.f32.mrf.mxu1  ;;  %v2131_v24 = vld [vmem:[%s4175_s0 + $0x111] sm:$0xff]  ;;  %s2946_s0 = smov [#allocation7]  }
  0xeb   :  { %2793 = vmatprep.mubr.f32.mxu0 %v3315_v26  ;;  %v322_v48 = vadd.f32 %v2497_v46, %v2441_v45  ;;  %v171_v38 = vpop.f32.mrf.mxu0  ;;  %s1969_s1 = sshll.u32 %s2946_s0, 4  ;;  %s1970_s1 = int_to_ptr.vmem [resolvable:$true] %s1969_s1 }
  0xec   :  { %v316_v52 = vpop.f32.mrf.mxu1  ;;  %s2859_s15 = scalar_lea.vmem %s1970_s1, 32  ;;  %p2864_p1 = scmp.lt.s32.totalorder %s1970_s1, %s1970_s1 }
  0xed   :  { %2847 = vmatmul.mubr.f32.gmra.mxu1 %v3584_v1  ;;  %v317_v53 = vadd.f32 %v316_v52, %v171_v38  ;;  %p2860_p0 = scmp.ne.s32.totalorder %s1970_s1, %s2859_s15  ;;  %p2865_p2 = scmp.lt.s32.totalorder %s2859_s15, %s2859_s15 }
  0xee   :  { %2794 = vmatmul.mubr.f32.gmra.mxu0 %v2099_v33  ;;  %2849 = vmatprep.mubr.f32.mxu1 %v3595_v6 }
  0xef   :  { %v2444_v50 = vpop.f32.mrf.mxu0  ;;  %p2866_p3 = por %p2865_p2, %p2864_p1 }
  0xf0   :  { %v2500_v54 = vpop.f32.mrf.mxu1 }
  0xf1   :  { %2850 = vmatmul.mubr.f32.gmra.mxu1 %v2131_v24  ;;  %v332_v26 = vadd.f32 %v2500_v54, %v2444_v50  ;;  %v181_v55 = vpop.f32.mrf.mxu0  ;;  %p2867_p4 = pnand %p2866_p3, %p2860_p0 }
  0xf2   :  { %v326_v58 = vpop.f32.mrf.mxu1 }
  0xf3   :  { %v327_v60 = vadd.f32 %v326_v58, %v181_v55 }
  0xf5   :  { %v2447_v35 = vpop.f32.mrf.mxu0 }
  0xf6   :  { %v2503_v41 = vpop.f32.mrf.mxu1 }
  0xf7   :  { %v342_v62 = vadd.f32 %v2503_v41, %v2447_v35  ;;  %v191_v43 = vpop.f32.mrf.mxu0 }
  0xf8   :  { %v336_v1 = vpop.f32.mrf.mxu1 }
  0xf9   :  { %v337_v49 = vadd.f32 %v336_v1, %v191_v43 }
  0xfb   :  { %v2450_v63 = vpop.f32.mrf.mxu0 }
  0xfc   :  { %v2506_v0 = vpop.f32.mrf.mxu1 }
  0xfd   :  { %v352_v6 = vadd.f32 %v2506_v0, %v2450_v63  ;;  %v201_v51 = vpop.f32.mrf.mxu0 }
  0xfe   :  { %v346_v57 = vpop.f32.mrf.mxu1 }
  0xff   :  { %v347_v2 = vadd.f32 %v346_v57, %v201_v51 }
 0x101   :  { %v2453_v4 = vpop.f32.mrf.mxu0 }
 0x102   :  { %v2509_v7 = vpop.f32.mrf.mxu1 }
 0x103   :  { %v362_v59 = vadd.f32 %v2509_v7, %v2453_v4  ;;  %v211_v10 = vpop.f32.mrf.mxu0 }
 0x104   :  { %v356_v12 = vpop.f32.mrf.mxu1 }
 0x105   :  { %v357_v13 = vadd.f32 %v356_v12, %v211_v10 }
 0x107   :  { %v2456_v3 = vpop.f32.mrf.mxu0 }
 0x108   :  { %v2512_v9 = vpop.f32.mrf.mxu1 }
 0x109   :  { %v372_v14 = vadd.f32 %v2512_v9, %v2456_v3  ;;  %v221_v15 = vpop.f32.mrf.mxu0 }
 0x10a   :  { %v366_v11 = vpop.f32.mrf.mxu1 }
 0x10b   :  { %v367_v17 = vadd.f32 %v366_v11, %v221_v15 }
 0x10d   :  { %v2459_v16 = vpop.f32.mrf.mxu0 }
 0x10e   :  { %v2515_v18 = vpop.f32.mrf.mxu1 }
 0x10f   :  { %v382_v19 = vadd.f32 %v2515_v18, %v2459_v16  ;;  %v231_v25 = vpop.f32.mrf.mxu0 }
 0x110   :  { %v376_v20 = vpop.f32.mrf.mxu1 }
 0x111   :  { %v3960_v23 = vadd.f32 %v376_v20, %v231_v25 }
 0x113   :  { %v2550_v21 = vpop.f32.mrf.mxu0 }
 0x114   :  { %v2606_v27 = vpop.f32.mrf.mxu1  ;;  %v564_v28 = vadd.f32 %v2550_v21, %v312_v39 }
 0x115   :  { %v484_v29 = vpop.f32.mrf.mxu0 }
 0x116   :  { %v678_v30 = vpop.f32.mrf.mxu1  ;;  %v3962_v34 = vadd.f32 %v2606_v27, %v564_v28  ;;  %v563_v31 = vadd.f32 %v484_v29, %v307_v22 }
 0x118   :  { %v757_v44 = vadd.f32 %v678_v30, %v563_v31 }
 0x119   :  { %v2553_v47 = vpop.f32.mrf.mxu0 }
 0x11a   :  { %v2609_v56 = vpop.f32.mrf.mxu1  ;;  %v566_v61 = vadd.f32 %v2553_v47, %v322_v48 }
 0x11b   :  { %v494_v32 = vpop.f32.mrf.mxu0 }
 0x11c   :  { %v688_v5 = vpop.f32.mrf.mxu1  ;;  %v3964_v8 = vadd.f32 %v2609_v56, %v566_v61  ;;  %v565_v36 = vadd.f32 %v494_v32, %v317_v53 }
 0x11e   :  { %v3966_v37 = vadd.f32 %v688_v5, %v565_v36 }
 0x120   :  { %v2556_v40 = vpop.f32.mrf.mxu0  ;;  %v2612_v42 = vpop.f32.mrf.mxu1 }
 0x121   :  { %v568_v45 = vadd.f32 %v2556_v40, %v332_v26 }
 0x122   :  { %v504_v39 = vpop.f32.mrf.mxu0  ;;  %v698_v46 = vpop.f32.mrf.mxu1 }
 0x123   :  { %v3968_v33 = vadd.f32 %v2612_v42, %v568_v45  ;;  %v567_v38 = vadd.f32 %v504_v39, %v327_v60 }
 0x125   :  { %v3970_v22 = vadd.f32 %v698_v46, %v567_v38 }
 0x126   :  { %v2559_v52 = vpop.f32.mrf.mxu0  ;;  %v2615_v24 = vpop.f32.mrf.mxu1 }
 0x127   :  { %v570_v48 = vadd.f32 %v2559_v52, %v342_v62 }
 0x128   :  { %v514_v50 = vpop.f32.mrf.mxu0  ;;  %v708_v54 = vpop.f32.mrf.mxu1 }
 0x129   :  { %v3972_v55 = vadd.f32 %v2615_v24, %v570_v48  ;;  %v569_v53 = vadd.f32 %v514_v50, %v337_v49 }
 0x12b   :  { %v3974_v58 = vadd.f32 %v708_v54, %v569_v53 }
 0x12c   :  { %v2562_v35 = vpop.f32.mrf.mxu0  ;;  %v2618_v41 = vpop.f32.mrf.mxu1 }
 0x12d   :  { %v572_v26 = vadd.f32 %v2562_v35, %v352_v6 }
 0x12e   :  { %v524_v43 = vpop.f32.mrf.mxu0  ;;  %v718_v1 = vpop.f32.mrf.mxu1 }
 0x12f   :  { %v3976_v63 = vadd.f32 %v2618_v41, %v572_v26  ;;  %v571_v60 = vadd.f32 %v524_v43, %v347_v2 }
 0x131   :  { %v3978_v0 = vadd.f32 %v718_v1, %v571_v60 }
 0x132   :  { %v2565_v51 = vpop.f32.mrf.mxu0  ;;  %v2621_v57 = vpop.f32.mrf.mxu1 }
 0x133   :  { %v574_v62 = vadd.f32 %v2565_v51, %v362_v59 }
 0x134   :  { %v534_v4 = vpop.f32.mrf.mxu0  ;;  %v728_v7 = vpop.f32.mrf.mxu1 }
 0x135   :  { %v3980_v10 = vadd.f32 %v2621_v57, %v574_v62  ;;  %v573_v49 = vadd.f32 %v534_v4, %v357_v13 }
 0x137   :  { %4185 = vst [vmem:[#allocation12_spill] sm:$0xff] %v3980_v10  ;;  %v3982_v12 = vadd.f32 %v728_v7, %v573_v49 }
 0x138   :  { %v2568_v3 = vpop.f32.mrf.mxu0  ;;  %v2624_v9 = vpop.f32.mrf.mxu1 }
 0x139   :  { %v576_v6 = vadd.f32 %v2568_v3, %v372_v14 }
 0x13a   :  { %v544_v15 = vpop.f32.mrf.mxu0  ;;  %v738_v11 = vpop.f32.mrf.mxu1 }
 0x13b   :  { %v3984_v16 = vadd.f32 %v2624_v9, %v576_v6  ;;  %v575_v2 = vadd.f32 %v544_v15, %v367_v17 }
 0x13d   :  { %4186 = vst [vmem:[#allocation13_spill] sm:$0xff] %v3984_v16  ;;  %v3986_v18 = vadd.f32 %v738_v11, %v575_v2 }
 0x13e   :  { %v2571_v25 = vpop.f32.mrf.mxu0  ;;  %v2627_v20 = vpop.f32.mrf.mxu1 }
 0x13f   :  { %4187 = vst [vmem:[#allocation14_spill] sm:$0xff] %v3986_v18  ;;  %v578_v59 = vadd.f32 %v2571_v25, %v382_v19 }
 0x140   :  { %v554_v21 = vpop.f32.mrf.mxu0  ;;  %v748_v27 = vpop.f32.mrf.mxu1 }
 0x141   :  { %v3988_v28 = vadd.f32 %v2627_v20, %v578_v59  ;;  %v577_v13 = vadd.f32 %v554_v21, %v3960_v23 }
 0x143   :  { %4188 = vst [vmem:[#allocation15_spill] sm:$0xff] %v3988_v28  ;;  %v3991_v29 = vadd.f32 %v748_v27, %v577_v13 }
 0x144   :  { %v887_v30 = vpop.f32.mrf.mxu0  ;;  %v3993_v14 = vpop.f32.mrf.mxu1 }
 0x145   :  { %4189 = vst [vmem:[#allocation16_spill] sm:$0xff] %v3991_v29  ;;  %v3995_v31 = vadd.f32 %v887_v30, %v757_v44 }
 0x146   :  { %v889_v47 = vpop.f32.mrf.mxu0  ;;  %v3997_v17 = vpop.f32.mrf.mxu1 }
 0x147   :  { %1853 = vst [vmem:[#allocation6] sm:$0xff] %v889_v47  ;;  %v1890_v2 = vmul.f32 %v889_v47, %v889_v47 }
 0x149   :  { %v893_v56 = vpop.f32.mrf.mxu0  ;;  %v3999_v61 = vpop.f32.mrf.mxu1 }
 0x14a   :  { %v4002_v19 = vadd.f32 %v893_v56, %v3962_v34 }
 0x14b   :  { %v895_v32 = vpop.f32.mrf.mxu0  ;;  %v4004_v5 = vpop.f32.mrf.mxu1 }
 0x14c   :  { %1854 = vst [vmem:[#allocation6 + $0x8] sm:$0xff] %v895_v32  ;;  %v1891_v15 = vmul.f32 %v895_v32, %v895_v32  ;;  %v1869_v25 = vadd.f32 %v895_v32, %v889_v47 }
 0x14e   :  { %v899_v23 = vpop.f32.mrf.mxu0  ;;  %v4006_v36 = vpop.f32.mrf.mxu1  ;;  %v1906_v27 = vadd.f32 %v1891_v15, %v1890_v2 }
 0x14f   :  { %v4009_v44 = vadd.f32 %v899_v23, %v3966_v37 }
 0x150   :  { %v901_v40 = vpop.f32.mrf.mxu0  ;;  %v4011_v42 = vpop.f32.mrf.mxu1 }
 0x151   :  { %1855 = vst [vmem:[#allocation6 + $0x10] sm:$0xff] %v901_v40  ;;  %v1892_v20 = vmul.f32 %v901_v40, %v901_v40  ;;  %v1870_v13 = vadd.f32 %v1869_v25, %v901_v40 }
 0x153   :  { %v4013_v45 = vpop.f32.mrf.mxu0  ;;  %v4015_v39 = vpop.f32.mrf.mxu1 }
 0x155   :  { %v907_v34 = vpop.f32.mrf.mxu0  ;;  %v4017_v46 = vpop.f32.mrf.mxu1 }
 0x156   :  { %1856 = vst [vmem:[#allocation6 + $0x18] sm:$0xff] %v907_v34  ;;  %v1893_v30 = vmul.f32 %v907_v34, %v907_v34 }
 0x158   :  { %v4019_v38 = vpop.f32.mrf.mxu0  ;;  %v4021_v52 = vpop.f32.mrf.mxu1 }
 0x15a   :  { %v913_v24 = vpop.f32.mrf.mxu0  ;;  %v4023_v48 = vpop.f32.mrf.mxu1 }
 0x15b   :  { %1857 = vst [vmem:[#allocation6 + $0x20] sm:$0xff] %v913_v24  ;;  %v1894_v29 = vmul.f32 %v913_v24, %v913_v24 }
 0x15d   :  { %v4025_v37 = vpop.f32.mrf.mxu0  ;;  %v4027_v50 = vpop.f32.mrf.mxu1 }
 0x15e   :  { %4190 = vst [vmem:[#allocation17_spill] sm:$0xff] %v4027_v50 }
 0x15f   :  { %v919_v54 = vpop.f32.mrf.mxu0  ;;  %v4029_v53 = vpop.f32.mrf.mxu1 }
 0x160   :  { %1858 = vst [vmem:[#allocation6 + $0x28] sm:$0xff] %v919_v54  ;;  %v1895_v47 = vmul.f32 %v919_v54, %v919_v54 }
 0x162   :  { %v4031_v35 = vpop.f32.mrf.mxu0  ;;  %v4033_v41 = vpop.f32.mrf.mxu1 }
 0x163   :  { %4191 = vst [vmem:[#allocation18_spill] sm:$0xff] %v4033_v41 }
 0x164   :  { %v925_v26 = vpop.f32.mrf.mxu0  ;;  %v4035_v43 = vpop.f32.mrf.mxu1 }
 0x165   :  { %4192 = vst [vmem:[#allocation19_spill] sm:$0xff] %v4035_v43  ;;  %1859 = vst [vmem:[#allocation6 + $0x30] sm:$0xff] %v925_v26  ;;  %v1896_v15 = vmul.f32 %v925_v26, %v925_v26 }
 0x167   :  { %v4037_v1 = vpop.f32.mrf.mxu0  ;;  %v4039_v60 = vpop.f32.mrf.mxu1 }
 0x168   :  { %4193 = vst [vmem:[#allocation20_spill] sm:$0xff] %v4039_v60  ;;  %v1871_v60 = vadd.f32 %v1870_v13, %v907_v34 }
 0x169   :  { %v931_v51 = vpop.f32.mrf.mxu0  ;;  %v4041_v57 = vpop.f32.mrf.mxu1 }
 0x16a   :  { %4194 = vst [vmem:[#allocation21_spill] sm:$0xff] %v4041_v57  ;;  %1860 = vst [vmem:[#allocation6 + $0x38] sm:$0xff] %v931_v51  ;;  %v1907_v57 = vadd.f32 %v1906_v27, %v1892_v20  ;;  %v1872_v41 = vadd.f32 %v1871_v60, %v913_v24  ;;  %v1897_v10 = vmul.f32 %v931_v51, %v931_v51 }
 0x16c   :  { %v4043_v62 = vpop.f32.mrf.mxu0  ;;  %v4045_v4 = vpop.f32.mrf.mxu1  ;;  %v1908_v28 = vadd.f32 %v1907_v57, %v1893_v30  ;;  %v1873_v16 = vadd.f32 %v1872_v41, %v919_v54 }
 0x16e   :  { %v937_v7 = vpop.f32.mrf.mxu0  ;;  %v4047_v49 = vpop.f32.mrf.mxu1  ;;  %v1909_v18 = vadd.f32 %v1908_v28, %v1894_v29  ;;  %v1874_v25 = vadd.f32 %v1873_v16, %v925_v26 }
 0x16f   :  { %1861 = vst [vmem:[#allocation6 + $0x40] sm:$0xff] %v937_v7  ;;  %v1898_v24 = vmul.f32 %v937_v7, %v937_v7 }
 0x170   :  { %v4049_v3 = vpop.f32.mrf.mxu0  ;;  %v1910_v2 = vadd.f32 %v1909_v18, %v1895_v47  ;;  %v1875_v57 = vadd.f32 %v1874_v25, %v931_v51 }
 0x171   :  { %v4051_v9 = vpop.f32.mrf.mxu1 }
 0x172   :  { %v943_v6 = vpop.f32.mrf.mxu0  ;;  %v1911_v27 = vadd.f32 %v1910_v2, %v1896_v15  ;;  %v1876_v29 = vadd.f32 %v1875_v57, %v937_v7 }
 0x173   :  { %1862 = vst [vmem:[#allocation6 + $0x48] sm:$0xff] %v943_v6  ;;  %v4053_v11 = vpop.f32.mrf.mxu1  ;;  %v1899_v54 = vmul.f32 %v943_v6, %v943_v6 }
 0x174   :  { %v1912_v28 = vadd.f32 %v1911_v27, %v1897_v10  ;;  %v1877_v18 = vadd.f32 %v1876_v29, %v943_v6 }
 0x175   :  { %v4055_v59 = vpop.f32.mrf.mxu0 }
 0x176   :  { %v4057_v21 = vpop.f32.mrf.mxu1  ;;  %v1913_v30 = vadd.f32 %v1912_v28, %v1898_v24 }
 0x177   :  { %v949_v56 = vpop.f32.mrf.mxu0 }
 0x178   :  { %1863 = vst [vmem:[#allocation6 + $0x50] sm:$0xff] %v949_v56  ;;  %v4059_v23 = vpop.f32.mrf.mxu1  ;;  %v1900_v16 = vmul.f32 %v949_v56, %v949_v56 }
 0x17a   :  { %v4061_v43 = vpop.f32.mrf.mxu0 }
 0x17b   :  { %v4063_v32 = vpop.f32.mrf.mxu1 }
 0x17c   :  { %v955_v50 = vpop.f32.mrf.mxu0 }
 0x17d   :  { %1864 = vst [vmem:[#allocation6 + $0x58] sm:$0xff] %v955_v50  ;;  %v4065_v40 = vpop.f32.mrf.mxu1  ;;  %v1901_v15 = vmul.f32 %v955_v50, %v955_v50 }
 0x17f   :  { %v4067_v20 = vpop.f32.mrf.mxu0 }
 0x180   :  { %4195 = vst [vmem:[#allocation22_spill] sm:$0xff] %v4067_v20  ;;  %v4069_v34 = vpop.f32.mrf.mxu1  ;;  %v1914_v20 = vadd.f32 %v1913_v30, %v1899_v54  ;;  %v985_v30 = vadd.f32 %v4013_v45, %v3964_v8 }
 0x181   :  { %4196 = vst [vmem:[#allocation23_spill] sm:$0xff] %v4069_v34  ;;  %v961_v60 = vpop.f32.mrf.mxu0  ;;  %v1878_v34 = vadd.f32 %v1877_v18, %v949_v56 }
 0x182   :  { %1865 = vst [vmem:[#allocation6 + $0x60] sm:$0xff] %v961_v60  ;;  %v4071_v13 = vpop.f32.mrf.mxu1  ;;  %v1915_v2 = vadd.f32 %v1914_v20, %v1900_v16 }
 0x183   :  { %4197 = vst [vmem:[#allocation24_spill] sm:$0xff] %v4071_v13  ;;  %v1879_v25 = vadd.f32 %v1878_v34, %v955_v50  ;;  %v1902_v13 = vmul.f32 %v961_v60, %v961_v60  ;;  %v1177_v50 = vadd.f32 %v3993_v14, %v4002_v19  ;;  %v987_v14 = vadd.f32 %v4025_v37, %v3968_v33 }
 0x184   :  { %v4073_v41 = vpop.f32.mrf.mxu0  ;;  %v1916_v27 = vadd.f32 %v1915_v2, %v1901_v15  ;;  %v988_v19 = vadd.f32 %v4031_v35, %v3974_v58 }
 0x185   :  { %v4075_v26 = vpop.f32.mrf.mxu1  ;;  %v1880_v57 = vadd.f32 %v1879_v25, %v961_v60  ;;  %v1176_v60 = vadd.f32 %v3997_v17, %v3995_v31  ;;  %v1372_v15 = vadd.f32 %v4045_v4, %v1177_v50  ;;  %v989_v31 = vadd.f32 %v4037_v1, %v3972_v55 }
 0x186   :  { %v967_v47 = vpop.f32.mrf.mxu0  ;;  %v1917_v29 = vadd.f32 %v1916_v27, %v1902_v13  ;;  %v986_v13 = vadd.f32 %v4019_v38, %v3970_v22  ;;  %v1179_v22 = vadd.f32 %v3999_v61, %v985_v30  ;;  %v1181_v61 = vadd.f32 %v4006_v36, %v987_v14 }
 0x187   :  { %1866 = vst [vmem:[#allocation6 + $0x68] sm:$0xff] %v967_v47  ;;  %v4077_v51 = vpop.f32.mrf.mxu1  ;;  %v1903_v6 = vmul.f32 %v967_v47, %v967_v47  ;;  %v1881_v56 = vadd.f32 %v1880_v57, %v967_v47  ;;  %v1371_v38 = vadd.f32 %v4047_v49, %v1176_v60  ;;  %v1183_v1 = vadd.f32 %v4015_v39, %v989_v31 }
 0x188   :  { %v1374_v37 = vadd.f32 %v4051_v9, %v1179_v22  ;;  %v1182_v49 = vadd.f32 %v4017_v46, %v988_v19  ;;  %v990_v9 = vadd.f32 %v4043_v62, %v3978_v0  ;;  %v992_v36 = vadd.f32 %v4055_v59, %v3982_v12 }
 0x189   :  { %v4079_v10 = vpop.f32.mrf.mxu0  ;;  %v1918_v34 = vadd.f32 %v1917_v29, %v1903_v6  ;;  %v1178_v6 = vadd.f32 %v4004_v5, %v4009_v44 }
 0x18a   :  { %v4081_v7 = vpop.f32.mrf.mxu1 }
 0x18b   :  { %v973_v24 = vpop.f32.mrf.mxu0  ;;  %v1373_v5 = vadd.f32 %v4053_v11, %v1178_v6 }
 0x18c   :  { %1867 = vst [vmem:[#allocation6 + $0x70] sm:$0xff] %v973_v24  ;;  %v4083_v28 = vpop.f32.mrf.mxu1  ;;  %v1904_v54 = vmul.f32 %v973_v24, %v973_v24  ;;  %v1882_v18 = vadd.f32 %v1881_v56, %v973_v24  ;;  %v1180_v24 = vadd.f32 %v4011_v42, %v986_v13 }
 0x18e   :  { %v4087_v20 = vpop.f32.mrf.mxu0  ;;  %v1919_v2 = vadd.f32 %v1918_v34, %v1904_v54  ;;  %v991_v34 = vadd.f32 %v4049_v3, %v3976_v63  ;;  %v1375_v63 = vadd.f32 %v4059_v23, %v1180_v24 }
 0x18f   :  { %v4091_v16 = vpop.f32.mrf.mxu1 }
 0x190   :  { %v979_v47 = vpop.f32.mrf.mxu0  ;;  %v1185_v14 = vadd.f32 %v4021_v52, %v991_v34 }
 0x191   :  { %1868 = vst [vmem:[#allocation6 + $0x78] sm:$0xff] %v979_v47  ;;  %v1883_v8 = vadd.f32 %v1882_v18, %v979_v47  ;;  %v1905_v45 = vmul.f32 %v979_v47, %v979_v47  ;;  %v4098_v25 = vpop.f32.mrf.mxu1  ;;  %v1376_v18 = vadd.f32 %v4057_v21, %v1181_v61  ;;  %v1184_v21 = vadd.f32 %v4023_v48, %v990_v9 }
 0x192   :  { %v2774_v17 = vpop.f32.mrf.mxu0 }
 0x193   :  { %v1884_v4 = vrot.slane %v1883_v8, 4  ;;  %v1920_v27 = vadd.f32 %v1919_v2, %v1905_v45  ;;  %v1567_v57 = vadd.f32 %v2774_v17, %v1372_v15  ;;  %v1378_v17 = vadd.f32 %v4063_v32, %v1183_v1 }
 0x194   :  { %v1487_v33 = vpop.f32.mrf.mxu0 }
 0x195   :  { %v1885_v58 = vadd.f32 %v1884_v4, %v1883_v8  ;;  %v1921_v35 = vrot.slane %v1920_v27, 4  ;;  %v2830_v29 = vpop.f32.mrf.mxu1  ;;  %v1566_v55 = vadd.f32 %v1487_v33, %v1371_v38  ;;  %v4128_v38 = vadd.f32 %v4029_v53, %v992_v36 }
 0x196   :  { %v1761_v56 = vadd.f32 %v2830_v29, %v1567_v57  ;;  %v2777_v54 = vpop.f32.mrf.mxu0  ;;  %v4198_v57 = vld [vmem:[#allocation12_spill] sm:$0xff] }
 0x197   :  { %v1886_v44 = vrot.slane %v1885_v58, 2  ;;  %v1922_v42 = vadd.f32 %v1921_v35, %v1920_v27  ;;  %v1681_v30 = vpop.f32.mrf.mxu1  ;;  %v1569_v50 = vadd.f32 %v2777_v54, %v1374_v37  ;;  %v993_v6 = vadd.f32 %v4061_v43, %v4198_v57  ;;  %v4199_v54 = vld [vmem:[#allocation23_spill] sm:$0xff] }
 0x198   :  { %1777 = vst [vmem:[#allocation2 + $0x8] sm:$0xff] %v1761_v56  ;;  %v1760_v39 = vadd.f32 %v1681_v30, %v1566_v55  ;;  %v1497_v46 = vpop.f32.mrf.mxu0  ;;  %v1814_v15 = vmul.f32 %v1761_v56, %v1761_v56  ;;  %v1377_v37 = vadd.f32 %v4065_v40, %v1182_v49  ;;  %v1380_v43 = vadd.f32 %v4199_v54, %v1185_v14 }
 0x199   :  { %v1887_v60 = vadd.f32 %v1886_v44, %v1885_v58  ;;  %v1923_v11 = vrot.slane %v1922_v42, 2  ;;  %v2833_v13 = vpop.f32.mrf.mxu1  ;;  %v1568_v47 = vadd.f32 %v1497_v46, %v1373_v5  ;;  %v4200_v5 = vld [vmem:[#allocation13_spill] sm:$0xff]  ;;  %v4202_v46 = vld [vmem:[#allocation22_spill] sm:$0xff] }
 0x19a   :  { %1776 = vst [vmem:[#allocation2] sm:$0xff] %v1760_v39  ;;  %v1792_v2 = vadd.f32 %v1761_v56, %v1760_v39  ;;  %v1813_v8 = vmul.f32 %v1760_v39, %v1760_v39  ;;  %v1763_v0 = vadd.f32 %v2833_v13, %v1569_v50  ;;  %v2780_v62 = vpop.f32.mrf.mxu0  ;;  %v995_v44 = vadd.f32 %v4073_v41, %v4200_v5  ;;  %v4201_v39 = vld [vmem:[#allocation14_spill] sm:$0xff]  ;;  %v4204_v13 = vld [vmem:[#allocation17_spill] sm:$0xff] }
 0x19b   :  { %v1691_v3 = vpop.f32.mrf.mxu1  ;;  %v1571_v45 = vadd.f32 %v2780_v62, %v1376_v18  ;;  %v1888_v12 = vrot.slane %v1887_v60, 1  ;;  %v1924_v59 = vadd.f32 %v1923_v11, %v1922_v42  ;;  %v994_v18 = vadd.f32 %v4202_v46, %v4201_v39 }
 0x19c   :  { %v1829_v19 = vadd.f32 %v1814_v15, %v1813_v8  ;;  %1779 = vst [vmem:[#allocation2 + $0x18] sm:$0xff] %v1763_v0  ;;  %v1762_v31 = vadd.f32 %v1691_v3, %v1568_v47  ;;  %v1507_v22 = vpop.f32.mrf.mxu0  ;;  %v1816_v29 = vmul.f32 %v1763_v0, %v1763_v0  ;;  %v1187_v47 = vadd.f32 %v4204_v13, %v993_v6 }
 0x19d   :  { %v2836_v4 = vpop.f32.mrf.mxu1  ;;  %v1570_v27 = vadd.f32 %v1507_v22, %v1375_v63  ;;  %v1925_v23 = vrot.slane %v1924_v59, 1  ;;  %v1889_v35 = vadd.f32 %v1888_v12, %v1887_v60  ;;  %v4203_v60 = vld [vmem:[#allocation24_spill] sm:$0xff] }
 0x19e   :  { %1778 = vst [vmem:[#allocation2 + $0x10] sm:$0xff] %v1762_v31  ;;  %v1793_v52 = vadd.f32 %v1792_v2, %v1762_v31  ;;  %v1815_v48 = vmul.f32 %v1762_v31, %v1762_v31  ;;  %v1765_v24 = vadd.f32 %v2836_v4, %v1571_v45  ;;  %v2783_v33 = vpop.f32.mrf.mxu0  ;;  %v1379_v11 = vadd.f32 %v4203_v60, %v1184_v21 }
 0x19f   :  { %v1701_v58 = vpop.f32.mrf.mxu1  ;;  %v1573_v32 = vadd.f32 %v2783_v33, %v1378_v17  ;;  %v1926_v53 = vadd.f32 %v1925_v23, %v1924_v59 }
 0x1a0   :  { %v1830_v55 = vadd.f32 %v1829_v19, %v1815_v48  ;;  %1781 = vst [vmem:[#allocation2 + $0x28] sm:$0xff] %v1765_v24  ;;  %v1764_v61 = vadd.f32 %v1701_v58, %v1570_v27  ;;  %v1794_v1 = vadd.f32 %v1793_v52, %v1763_v0  ;;  %v1517_v56 = vpop.f32.mrf.mxu0 }
 0x1a1   :  { %v2839_v42 = vpop.f32.mrf.mxu1  ;;  %v1572_v30 = vadd.f32 %v1517_v56, %v1377_v37  ;;  %v1927_v40 = vsel %vm1850_vm0, %v1889_v35, %v1926_v53 }
 0x1a2   :  { %1780 = vst [vmem:[#allocation2 + $0x20] sm:$0xff] %v1764_v61  ;;  %v1795_v49 = vadd.f32 %v1794_v1, %v1764_v61  ;;  %v1817_v50 = vmul.f32 %v1764_v61, %v1764_v61  ;;  %v1831_v9 = vadd.f32 %v1830_v55, %v1816_v29  ;;  %v1767_v34 = vadd.f32 %v2839_v42, %v1573_v32  ;;  %v2786_v36 = vpop.f32.mrf.mxu0 }
 0x1a3   :  { %1928 = vst [vmem:[#allocation7] sm:$0x3] %v1927_v40  ;;  %v1711_v15 = vpop.f32.mrf.mxu1  ;;  %v1575_v41 = vadd.f32 %v2786_v36, %v1380_v43 }
 0x1a4   :  { %2870 = shalt.err (!%p2867_p4)
}
 0x1a5   :  { %1972 = dma.vmem_to_hbm [thread:$0]  %s1970_s1, 32, %s4184_s9, [#allocation8]   ;;  %v1818_v2 = vmul.f32 %v1765_v24, %v1765_v24  ;;  %v1832_v8 = vadd.f32 %v1831_v9, %v1817_v50  ;;  %1783 = vst [vmem:[#allocation2 + $0x38] sm:$0xff] %v1767_v34  ;;  %v1766_v0 = vadd.f32 %v1711_v15, %v1572_v30  ;;  %v1796_v62 = vadd.f32 %v1795_v49, %v1765_v24  ;;  %v1527_v63 = vpop.f32.mrf.mxu0  ;;  %v4205_v45 = vld [vmem:[#allocation18_spill] sm:$0xff]  ;;  %v4206_v59 = vld [vmem:[#allocation15_spill] sm:$0xff]  ;;  %v2842_v21 = vpop.f32.mrf.mxu1  ;;  %v4208_v58 = vld [vmem:[#allocation16_spill] sm:$0xff] }
 0x1a6   :  { %v1382_v3 = vadd.f32 %v4075_v26, %v1187_v47  ;;  %v1189_v12 = vadd.f32 %v4205_v45, %v995_v44  ;;  %v997_v14 = vadd.f32 %v4087_v20, %v4206_v59  ;;  %v1574_v19 = vadd.f32 %v1527_v63, %v1379_v11  ;;  %v4207_v57 = vld [vmem:[#allocation19_spill] sm:$0xff]  ;;  %v4209_v53 = vld [vmem:[#allocation20_spill] sm:$0xff]  ;;  %v4210_v50 = vld [vmem:[#allocation21_spill] sm:$0xff]  ;;  %s2947_s9 = smov [#allocation2]  }
 0x1a7   :  { %1782 = vst [vmem:[#allocation2 + $0x30] sm:$0xff] %v1766_v0  ;;  %v1797_v31 = vadd.f32 %v1796_v62, %v1766_v0  ;;  %v1819_v22 = vmul.f32 %v1766_v0, %v1766_v0  ;;  %v1833_v17 = vadd.f32 %v1832_v8, %v1818_v2  ;;  %v1769_v4 = vadd.f32 %v2842_v21, %v1575_v41  ;;  %v2789_v27 = vpop.f32.mrf.mxu0  ;;  %v1721_v52 = vpop.f32.mrf.mxu1  ;;  %s1934_s4 = sshll.u32 %s2947_s9, 4  ;;  %s1935_s4 = int_to_ptr.vmem [resolvable:$true] %s1934_s4 }
 0x1a8   :  { %v1381_v23 = vadd.f32 %v4077_v51, %v4128_v38  ;;  %v1188_v6 = vadd.f32 %v4207_v57, %v994_v18  ;;  %v1577_v26 = vadd.f32 %v2789_v27, %v1382_v3  ;;  %v1820_v48 = vmul.f32 %v1767_v34, %v1767_v34  ;;  %s2879_s18 = scalar_lea.vmem %s1935_s4, 2048  ;;  %p2884_p6 = scmp.lt.s32.totalorder %s1935_s4, %s1935_s4 }
 0x1a9   :  { %v1834_v24 = vadd.f32 %v1833_v17, %v1819_v22  ;;  %1785 = vst [vmem:[#allocation2 + $0x48] sm:$0xff] %v1769_v4  ;;  %v1768_v33 = vadd.f32 %v1721_v52, %v1574_v19  ;;  %v1798_v20 = vadd.f32 %v1797_v31, %v1767_v34  ;;  %v1537_v37 = vpop.f32.mrf.mxu0  ;;  %v996_v32 = vadd.f32 %v4079_v10, %v4208_v58  ;;  %v2845_v55 = vpop.f32.mrf.mxu1  ;;  %p2880_p5 = scmp.ne.s32.totalorder %s1935_s4, %s2879_s18  ;;  %p2885_p7 = scmp.lt.s32.totalorder %s2879_s18, %s2879_s18 }
 0x1aa   :  { %v1384_v35 = vadd.f32 %v4081_v7, %v1189_v12  ;;  %v1191_v29 = vadd.f32 %v4209_v53, %v997_v14  ;;  %v1576_v61 = vadd.f32 %v1537_v37, %v1381_v23  ;;  %v1771_v56 = vadd.f32 %v2845_v55, %v1577_v26 }
 0x1ab   :  { %1784 = vst [vmem:[#allocation2 + $0x40] sm:$0xff] %v1768_v33  ;;  %v1799_v51 = vadd.f32 %v1798_v20, %v1768_v33  ;;  %v1821_v38 = vmul.f32 %v1768_v33, %v1768_v33  ;;  %v1835_v1 = vadd.f32 %v1834_v24, %v1820_v48  ;;  %v2792_v54 = vpop.f32.mrf.mxu0  ;;  %v1383_v43 = vadd.f32 %v4083_v28, %v1188_v6  ;;  %v1731_v5 = vpop.f32.mrf.mxu1  ;;  %p2886_p8 = por %p2885_p7, %p2884_p6 }
 0x1ac   :  { %v1579_v44 = vadd.f32 %v2792_v54, %v1384_v35  ;;  %v1822_v42 = vmul.f32 %v1769_v4, %v1769_v4  ;;  %1787 = vst [vmem:[#allocation2 + $0x58] sm:$0xff] %v1771_v56  ;;  %v1770_v10 = vadd.f32 %v1731_v5, %v1576_v61  ;;  %v1386_v49 = vadd.f32 %v4091_v16, %v1191_v29 }
 0x1ad   :  { %v1836_v30 = vadd.f32 %v1835_v1, %v1821_v38  ;;  %v1800_v40 = vadd.f32 %v1799_v51, %v1769_v4  ;;  %v1547_v7 = vpop.f32.mrf.mxu0  ;;  %v1190_v9 = vadd.f32 %v4210_v50, %v996_v32  ;;  %v2848_v34 = vpop.f32.mrf.mxu1  ;;  %v1824_v15 = vmul.f32 %v1771_v56, %v1771_v56  ;;  %p2887_p9 = pnand %p2886_p8, %p2880_p5 }
 0x1ae   :  { %v1578_v36 = vadd.f32 %v1547_v7, %v1383_v43  ;;  %1786 = vst [vmem:[#allocation2 + $0x50] sm:$0xff] %v1770_v10  ;;  %v1823_v46 = vmul.f32 %v1770_v10, %v1770_v10  ;;  %v1773_v60 = vadd.f32 %v2848_v34, %v1579_v44 }
 0x1af   :  { %v1801_v39 = vadd.f32 %v1800_v40, %v1770_v10  ;;  %v1837_v18 = vadd.f32 %v1836_v30, %v1822_v42  ;;  %v2795_v28 = vpop.f32.mrf.mxu0  ;;  %v1385_v11 = vadd.f32 %v4098_v25, %v1190_v9  ;;  %v1741_v13 = vpop.f32.mrf.mxu1 }
 0x1b0   :  { %v1581_v47 = vadd.f32 %v2795_v28, %v1386_v49  ;;  %1789 = vst [vmem:[#allocation2 + $0x68] sm:$0xff] %v1773_v60  ;;  %v1772_v2 = vadd.f32 %v1741_v13, %v1578_v36  ;;  %v1826_v25 = vmul.f32 %v1773_v60, %v1773_v60 }
 0x1b1   :  { %v1838_v41 = vadd.f32 %v1837_v18, %v1823_v46  ;;  %v1802_v8 = vadd.f32 %v1801_v39, %v1771_v56  ;;  %v1557_v16 = vpop.f32.mrf.mxu0  ;;  %v2851_v0 = vpop.f32.mrf.mxu1 }
 0x1b2   :  { %v1580_v62 = vadd.f32 %v1557_v16, %v1385_v11  ;;  %1788 = vst [vmem:[#allocation2 + $0x60] sm:$0xff] %v1772_v2  ;;  %v1825_v3 = vmul.f32 %v1772_v2, %v1772_v2  ;;  %v1775_v12 = vadd.f32 %v2851_v0, %v1581_v47 }
 0x1b3   :  { %v1803_v63 = vadd.f32 %v1802_v8, %v1772_v2  ;;  %v1839_v45 = vadd.f32 %v1838_v41, %v1824_v15  ;;  %v1751_v59 = vpop.f32.mrf.mxu1 }
 0x1b4   :  { %1791 = vst [vmem:[#allocation2 + $0x78] sm:$0xff] %v1775_v12  ;;  %v1774_v21 = vadd.f32 %v1751_v59, %v1580_v62 }
 0x1b5   :  { %v1840_v14 = vadd.f32 %v1839_v45, %v1825_v3  ;;  %v1804_v19 = vadd.f32 %v1803_v63, %v1773_v60 }
 0x1b6   :  { %1790 = vst [vmem:[#allocation2 + $0x70] sm:$0xff] %v1774_v21  ;;  %v1827_v22 = vmul.f32 %v1774_v21, %v1774_v21 }
 0x1b7   :  { %v1805_v31 = vadd.f32 %v1804_v19, %v1774_v21  ;;  %v1841_v17 = vadd.f32 %v1840_v14, %v1826_v25 }
 0x1b8   :  { %2890 = shalt.err (!%p2887_p9)
}
 0x1b9   :  { %s2948_s19 = smov 128   ;;  %s2949_s20 = smov 8   ;;  %v1828_v4 = vmul.f32 %v1775_v12, %v1775_v12  ;;  %v1806_v27 = vadd.f32 %v1805_v31, %v1775_v12  ;;  %v1842_v23 = vadd.f32 %v1841_v17, %v1827_v22 }
 0x1ba   :  { %1940 = dma.vmem_to_hbm [thread:$0]  %s1935_s4, 2048, %s4181_s6, [#allocation3], %s2948_s19, %s2948_s19, %s2949_s20  }
 0x1bb   :  { %v1807_v57 = vrot.slane %v1806_v27, 4  ;;  %v1843_v6 = vadd.f32 %v1842_v23, %v1828_v4  ;;  %s2950_s23 = smov [#allocation4]   ;;  %s2951_s25 = smov [#allocation6]  }
 0x1bc   :  { %s1947_s24 = sshll.u32 %s2950_s23, 4  ;;  %s1956_s26 = sshll.u32 %s2951_s25, 4  ;;  %s1948_s24 = int_to_ptr.vmem [resolvable:$true] %s1947_s24  ;;  %s1957_s26 = int_to_ptr.vmem [resolvable:$true] %s1956_s26 }
 0x1bd   :  { %v1808_v52 = vadd.f32 %v1807_v57, %v1806_v27  ;;  %v1844_v26 = vrot.slane %v1843_v6, 4  ;;  %s2899_s6 = scalar_lea.vmem %s1948_s24, 32  ;;  %p2904_p11 = scmp.lt.s32.totalorder %s1948_s24, %s1948_s24 }
 0x1be   :  { %p2900_p10 = scmp.ne.s32.totalorder %s1948_s24, %s2899_s6  ;;  %p2905_p12 = scmp.lt.s32.totalorder %s2899_s6, %s2899_s6 }
 0x1bf   :  { %v1809_v48 = vrot.slane %v1808_v52, 2  ;;  %v1845_v24 = vadd.f32 %v1844_v26, %v1843_v6 }
 0x1c0   :  { %p2906_p13 = por %p2905_p12, %p2904_p11 }
 0x1c1   :  { %v1810_v33 = vadd.f32 %v1809_v48, %v1808_v52  ;;  %v1846_v20 = vrot.slane %v1845_v24, 2 }
 0x1c2   :  { %p2907_p0 = pnand %p2906_p13, %p2900_p10 }
 0x1c3   :  { %v1811_v37 = vrot.slane %v1810_v33, 1  ;;  %v1847_v58 = vadd.f32 %v1846_v20, %v1845_v24 }
 0x1c5   :  { %v1848_v32 = vrot.slane %v1847_v58, 1  ;;  %v1812_v35 = vadd.f32 %v1811_v37, %v1810_v33 }
 0x1c7   :  { %v1849_v53 = vadd.f32 %v1848_v32, %v1847_v58 }
 0x1c9   :  { %v1851_v29 = vsel %vm1850_vm0, %v1812_v35, %v1849_v53 }
 0x1ca   :  { %1852 = vst [vmem:[#allocation4] sm:$0x3] %v1851_v29 }
 0x1cb   :  { %2910 = shalt.err (!%p2907_p0)
}
 0x1cc   :  { %1950 = dma.vmem_to_hbm [thread:$0]  %s1948_s24, 32, %s4182_s7, [#allocation5]  }
 0x1cd   :  { %s2919_s29 = scalar_lea.vmem %s1957_s26, 2048  ;;  %p2924_p2 = scmp.lt.s32.totalorder %s1957_s26, %s1957_s26 }
 0x1ce   :  { %p2920_p1 = scmp.ne.s32.totalorder %s1957_s26, %s2919_s29  ;;  %p2925_p3 = scmp.lt.s32.totalorder %s2919_s29, %s2919_s29 }
 0x1d0   :  { %p2926_p4 = por %p2925_p3, %p2924_p2 }
 0x1d2   :  { %p2927_p5 = pnand %p2926_p4, %p2920_p1 }
 0x1d4   :  { %2930 = shalt.err (!%p2927_p5)
}
 0x1d5   :  { %1962 = dma.vmem_to_hbm [thread:$0]  %s1957_s26, 2048, %s4183_s8, [#allocation5], %s2948_s19, %s2948_s19, %s2949_s20  }
 0x1d6   :  { %2939 = dma.done.wait [#allocation3], 2048  }
 0x1d7   :  { %2940 = vsyncadd [#allocation3], 4294965248 }
 0x1d8   :  { %2941 = dma.done.wait [#allocation5], 2080  }
 0x1d9   :  { %2942 = vsyncadd [#allocation5], 4294965216 }
 0x1da   :  { %2943 = dma.done.wait [#allocation8], 32  }
 0x1db   :  { %2944 = vsyncadd [#allocation8], 4294967264 }
 0x1dc   :  { %1985 = vsyncpa [#allocation3], 1 }
 0x1dd   :  { %1986 = vsyncpa [#allocation5], 1 }
 0x1de   :  { %1987 = vsyncpa [#allocation8], 1 }

</bundles_post_ra>
